<compile_context>
chip_gen: v5e
topology: v5e:2x2
jax: 0.10.0
libtpu: 0.0.40
codegen_flags: <defaults>
</compile_context>

<pallas_src>
import functools

import numpy as np
import jax
import jax.numpy as jnp
from jax.experimental import pallas as pl
from jax.experimental.pallas import tpu as pltpu

LOG_2PI = float(np.log(2.0 * np.pi))


def _round_up(a, m):
    return ((a + m - 1) // m) * m


def _choose_tile_rows(rows, max_rows):
    """Packed rows per grid step: aim for >= ~8 grid steps, multiple of 8 sublanes."""
    if rows <= 8:
        return rows                       # tiny batch: single full-extent block
    target = _round_up(pl.cdiv(rows, 8), 8)
    return int(max(8, min(max_rows, target)))


def _mvn_logprob_kernel(x_ref, mblk_ref, c_ref, g_ref, bias_ref, out_ref, *, csplit, cd):
    """One batch tile of packed samples.

    x_ref:    (TR, pack*D)    packed samples; csplit chunks of cd = compute_pack*D lanes
    mblk_ref: (cd, CP*K*D)    block-diag Linv stack: (x_p @ Mblk)[pKD+kD+e] = (Linv_k x_p)_e
    c_ref:    (1, CP*K*D)     (Linv_k mu_k)_e tiled over the packed samples
    g_ref:    (CP*K*D, CP*K)  block-diag group-sum with the -0.5 folded in
    bias_ref: (1, CP*K)       -0.5*D*log(2pi) - sum(log(diag(L_k))), tiled
    out_ref:  (TR, pack*K)    lane-dense packed log-probs
    """
    mblk = mblk_ref[...]
    c = c_ref[...]
    g = g_ref[...]
    bias = bias_ref[...]
    parts = []
    for s in range(csplit):                                   # static, tiny unroll
        xs = x_ref[:, s * cd:(s + 1) * cd].astype(jnp.float32)        # (TR, CP*D)
        y = jnp.dot(xs, mblk, preferred_element_type=jnp.float32)     # (TR, CP*K*D)
        z = y - c
        parts.append(jnp.dot(z * z, g, preferred_element_type=jnp.float32) + bias)
    out_ref[...] = parts[0] if csplit == 1 else jnp.concatenate(parts, axis=-1)


def prepare_mvn_params(mu, weight, eps=1e-5, compute_pack=16, csplit=None):
    """One-time parameter prep (cholesky / triangular inverse / packing) in plain JAX.

    mu:     (1, 1, K, D),  weight: (1, 1, K, D, D)
    Returns (Mblk[CP*D, CP*K*D], c[1, CP*K*D], G[CP*K*D, CP*K], bias[1, CP*K], csplit)
    where CP = compute_pack and the total row-packing factor is pack = csplit * CP.
    """
    w = weight[0, 0].astype(jnp.float32)                              # (K, D, D)
    mu_k = mu[0, 0].astype(jnp.float32)                               # (K, D)
    K, D = mu_k.shape
    if csplit is None:
        # Enough compute chunks per packed row to make the output ~128 lanes wide.
        csplit = max(1, int(np.ceil(128.0 / (compute_pack * K))))

    cov = jnp.einsum("kvx,kux->kvu", w, w) + eps * jnp.eye(D, dtype=jnp.float32)
    L = jnp.linalg.cholesky(cov)                                      # (K, D, D)
    eye = jnp.broadcast_to(jnp.eye(D, dtype=jnp.float32), (K, D, D))
    Linv = jax.scipy.linalg.solve_triangular(L, eye, lower=True)      # (K, D, D)
    logdet = jnp.sum(jnp.log(jnp.diagonal(L, axis1=-2, axis2=-1)), axis=-1)   # (K,)

    # Single-sample blocks.
    M1 = jnp.transpose(Linv, (2, 0, 1)).reshape(D, K * D)             # (x@M1)[kD+e]=(Linv_k x)_e
    c1 = jnp.einsum("ked,kd->ke", Linv, mu_k).reshape(K * D)          # (Linv_k mu_k)_e
    bias1 = -0.5 * D * LOG_2PI - logdet                                # (K,)

    # Block-diagonal packing over compute_pack samples per matmul.
    CP = compute_pack
    Mblk = jnp.kron(jnp.eye(CP, dtype=jnp.float32), M1)               # (CP*D, CP*K*D)
    cblk = jnp.tile(c1, CP).reshape(1, CP * K * D)
    # Group-sum with the -0.5 folded into the nonzero entries.
    Gblk = jnp.kron(jnp.eye(CP * K, dtype=jnp.float32),
                    jnp.full((D, 1), -0.5, dtype=jnp.float32))        # (CP*K*D, CP*K)
    biasblk = jnp.tile(bias1, CP).reshape(1, CP * K)
    return Mblk, cblk, Gblk, biasblk, csplit


@functools.partial(jax.jit, static_argnames=("csplit", "tb"))
def born_mvn_forward_prepared(x, Mblk, cblk, Gblk, biasblk, *, csplit, tb=2048):
    """Hot path only: log-prob for x given prepared (packed) params."""
    B, D = x.shape
    CPD, CPKD = Mblk.shape
    CP = CPD // D
    CPK = biasblk.shape[1]
    K = CPK // CP
    pack = csplit * CP                                   # samples per packed row

    B_pad = _round_up(B, pack)
    if B_pad != B:
        x = jnp.pad(x, ((0, B_pad - B), (0, 0)))
    rows = B_pad // pack
    x_packed = x.reshape(rows, pack * D)                 # contiguous row-major: free

    max_rows = max(8, tb // pack)
    tile_rows = _choose_tile_rows(rows, max_rows)
    grid = (pl.cdiv(rows, tile_rows),)

    kernel = functools.partial(_mvn_logprob_kernel, csplit=csplit, cd=CP * D)

    out = pl.pallas_call(
        kernel,
        out_shape=jax.ShapeDtypeStruct((rows, pack * K), jnp.float32),
        grid=grid,
        in_specs=[
            pl.BlockSpec((tile_rows, pack * D), lambda i: (i, 0)),   # x tile (double-buffered)
            pl.BlockSpec((CPD, CPKD), lambda i: (0, 0)),             # Mblk (resident)
            pl.BlockSpec((1, CPKD), lambda i: (0, 0)),               # c    (resident)
            pl.BlockSpec((CPKD, CPK), lambda i: (0, 0)),             # G    (resident)
            pl.BlockSpec((1, CPK), lambda i: (0, 0)),                # bias (resident)
        ],
        out_specs=pl.BlockSpec((tile_rows, pack * K), lambda i: (i, 0)),
        compiler_params=pltpu.CompilerParams(
            dimension_semantics=("parallel",)),                      # megacore on v7x
    )(x_packed, Mblk, cblk, Gblk, biasblk)

    log_prob = out.reshape(B_pad, K)[:B].reshape(B, 1, 1, K)
    return log_prob, jnp.ones_like(log_prob)


def born_mvn_forward(x, mu, weight, eps=1e-5, tb=2048, compute_pack=16):
    """JAX/Pallas equivalent of BornMultivariateNormalDistribution.forward.

    x: (B, D);  mu: (1, 1, K, D);  weight: (1, 1, K, D, D)
    returns (log_prob[B,1,1,K], ones[B,1,1,K])

    compute_pack: samples per block-diagonal matmul (16 fills the 256-deep MXU on
    v6e/v7x; use 8 on v5e).  Parameter prep (cholesky etc.) should be hoisted /
    cached across forward calls when mu/weight are reused.
    """
    Mblk, cblk, Gblk, biasblk, csplit = prepare_mvn_params(
        mu, weight, eps, compute_pack=compute_pack)
    return born_mvn_forward_prepared(x, Mblk, cblk, Gblk, biasblk,
                                     csplit=csplit, tb=tb)


def _reference_forward(x, mu, weight, eps=1e-5):
    """Pure-JAX reference (mirrors torch.distributions.MultivariateNormal)."""
    B, D = x.shape
    w = weight[0, 0]
    cov = jnp.einsum("kvx,kux->kvu", w, w) + eps * jnp.eye(D, dtype=w.dtype)
    L = jnp.linalg.cholesky(cov)
    diff = x[:, None, :] - mu[0, 0][None, :, :]                      # (B, K, D)
    y = jax.scipy.linalg.solve_triangular(
        L[None], diff[..., None], lower=True)[..., 0]                # (B, K, D)
    m = jnp.sum(y * y, axis=-1)                                      # (B, K)
    half_logdet = jnp.sum(jnp.log(jnp.diagonal(L, axis1=-2, axis2=-1)), -1)
    logp = -0.5 * (D * LOG_2PI + m) - half_logdet[None, :]
    return logp.reshape(B, 1, 1, x.shape[-1] // D * 0 + m.shape[-1])


if __name__ == "__main__":
    # Single region / single replica, K components, D variables.
    B, K, D = 8, 4, 16
    init_scale = 1.0

    key = jax.random.PRNGKey(0)
    kx, kmu, kw = jax.random.split(key, 3)

    x = jax.random.normal(kx, (B, D), dtype=jnp.float32)
    mu = jax.random.normal(kmu, (1, 1, K, D), dtype=jnp.float32)
    weight = init_scale * jax.random.normal(kw, (1, 1, K, D, D), dtype=jnp.float32)

    log_prob, ones = born_mvn_forward(x, mu, weight)
    jax.block_until_ready((log_prob, ones))

    ref = _reference_forward(x, mu, weight)
    assert log_prob.shape == (B, 1, 1, K)
    assert ones.shape == (B, 1, 1, K)
    np.testing.assert_allclose(np.asarray(log_prob), np.asarray(ref),
                               rtol=1e-4, atol=1e-4)
    assert np.all(np.asarray(ones) == 1.0)

    # Larger batch spanning multiple grid tiles with a ragged tail (B2 % pack != 0).
    B2 = 5000
    x2 = jax.random.normal(jax.random.PRNGKey(1), (B2, D), dtype=jnp.float32)
    log_prob2, _ = born_mvn_forward(x2, mu, weight, tb=1024)
    jax.block_until_ready(log_prob2)
    ref2 = _reference_forward(x2, mu, weight)
    np.testing.assert_allclose(np.asarray(log_prob2), np.asarray(ref2),
                               rtol=1e-4, atol=1e-4)

    print("KERNEL_OK")
</pallas_src>

<mosaic_0001>
module attributes {stable_mosaic.version = 11 : i64} {
  func.func @_mvn_logprob_kernel(%arg0: i32, %arg1: memref<1x512xf32, #tpu.memory_space<vmem>>, %arg2: memref<256x1024xf32, #tpu.memory_space<vmem>>, %arg3: memref<1x1024xf32, #tpu.memory_space<vmem>>, %arg4: memref<1024x64xf32, #tpu.memory_space<vmem>>, %arg5: memref<1x64xf32, #tpu.memory_space<vmem>>, %arg6: memref<1x128xf32, #tpu.memory_space<vmem>>) attributes {dimension_semantics = [#tpu.dimension_semantics<parallel>], iteration_bounds = array<i64: 1>, scalar_prefetch = 0 : i64, scratch_operands = 0 : i64, tpu.core_type = #tpu.core_type<tc>, window_params = [{transform_indices = @transform_0, window_bounds = array<i64: 1, 512>}, {pipeline_mode = #tpu.pipeline_mode<synchronous>, transform_indices = @transform_1, window_bounds = array<i64: 256, 1024>}, {pipeline_mode = #tpu.pipeline_mode<synchronous>, transform_indices = @transform_2, window_bounds = array<i64: 1, 1024>}, {pipeline_mode = #tpu.pipeline_mode<synchronous>, transform_indices = @transform_3, window_bounds = array<i64: 1024, 64>}, {pipeline_mode = #tpu.pipeline_mode<synchronous>, transform_indices = @transform_4, window_bounds = array<i64: 1, 64>}, {transform_indices = @transform_5, window_bounds = array<i64: 1, 128>}]} {
    %c0 = arith.constant 0 : index
    %c0_0 = arith.constant 0 : index
    %0 = vector.load %arg2[%c0, %c0_0] : memref<256x1024xf32, #tpu.memory_space<vmem>>, vector<256x1024xf32>
    %c0_1 = arith.constant 0 : index
    %c0_2 = arith.constant 0 : index
    %1 = vector.load %arg3[%c0_1, %c0_2] : memref<1x1024xf32, #tpu.memory_space<vmem>>, vector<1x1024xf32>
    %c0_3 = arith.constant 0 : index
    %c0_4 = arith.constant 0 : index
    %2 = vector.load %arg4[%c0_3, %c0_4] : memref<1024x64xf32, #tpu.memory_space<vmem>>, vector<1024x64xf32>
    %c0_5 = arith.constant 0 : index
    %c0_6 = arith.constant 0 : index
    %3 = vector.load %arg5[%c0_5, %c0_6] : memref<1x64xf32, #tpu.memory_space<vmem>>, vector<1x64xf32>
    %c0_7 = arith.constant 0 : index
    %c0_8 = arith.constant 0 : index
    %4 = vector.load %arg1[%c0_7, %c0_8] : memref<1x512xf32, #tpu.memory_space<vmem>>, vector<1x256xf32>
    %cst = arith.constant dense<0.000000e+00> : vector<1x1024xf32>
    %5 = tpu.matmul %4, %0, %cst {dimension_numbers = #tpu.dot_dimension_numbers<[1], [0], [0], [1], [0, 0, 1, 1], [], []>} : vector<1x256xf32>, vector<256x1024xf32>, vector<1x1024xf32> -> vector<1x1024xf32>
    %6 = arith.subf %5, %1 : vector<1x1024xf32>
    %7 = arith.mulf %6, %6 : vector<1x1024xf32>
    %cst_9 = arith.constant dense<0.000000e+00> : vector<1x64xf32>
    %8 = tpu.matmul %7, %2, %cst_9 {dimension_numbers = #tpu.dot_dimension_numbers<[1], [0], [0], [1], [0, 0, 1, 1], [], []>} : vector<1x1024xf32>, vector<1024x64xf32>, vector<1x64xf32> -> vector<1x64xf32>
    %9 = arith.addf %8, %3 : vector<1x64xf32>
    %c0_10 = arith.constant 0 : index
    %c256 = arith.constant 256 : index
    %10 = vector.load %arg1[%c0_10, %c256] : memref<1x512xf32, #tpu.memory_space<vmem>>, vector<1x256xf32>
    %cst_11 = arith.constant dense<0.000000e+00> : vector<1x1024xf32>
    %11 = tpu.matmul %10, %0, %cst_11 {dimension_numbers = #tpu.dot_dimension_numbers<[1], [0], [0], [1], [0, 0, 1, 1], [], []>} : vector<1x256xf32>, vector<256x1024xf32>, vector<1x1024xf32> -> vector<1x1024xf32>
    %12 = arith.subf %11, %1 : vector<1x1024xf32>
    %13 = arith.mulf %12, %12 : vector<1x1024xf32>
    %cst_12 = arith.constant dense<0.000000e+00> : vector<1x64xf32>
    %14 = tpu.matmul %13, %2, %cst_12 {dimension_numbers = #tpu.dot_dimension_numbers<[1], [0], [0], [1], [0, 0, 1, 1], [], []>} : vector<1x1024xf32>, vector<1024x64xf32>, vector<1x64xf32> -> vector<1x64xf32>
    %15 = arith.addf %14, %3 : vector<1x64xf32>
    %16 = tpu.concatenate %9, %15 in 1 : vector<1x64xf32>, vector<1x64xf32> -> vector<1x128xf32>
    %c0_13 = arith.constant 0 : index
    %c0_14 = arith.constant 0 : index
    %17 = vector.load %arg6[%c0_13, %c0_14] : memref<1x128xf32, #tpu.memory_space<vmem>>, vector<1x128xf32>
    tpu.vector_store %arg6[%c0_13, %c0_14], %16 {strides = array<i32>} : memref<1x128xf32, #tpu.memory_space<vmem>>, vector<1x128xf32>,
    return
  }
  func.func @transform_0(%arg0: i32) -> (i32, i32) {
    %c0_i32 = arith.constant 0 : i32
    %c0_i32_0 = arith.constant 0 : i32
    return %arg0, %c0_i32 : i32, i32
  }
  func.func @transform_1(%arg0: i32) -> (i32, i32) {
    %c0_i32 = arith.constant 0 : i32
    %c0_i32_0 = arith.constant 0 : i32
    %c0_i32_1 = arith.constant 0 : i32
    return %c0_i32, %c0_i32_0 : i32, i32
  }
  func.func @transform_2(%arg0: i32) -> (i32, i32) {
    %c0_i32 = arith.constant 0 : i32
    %c0_i32_0 = arith.constant 0 : i32
    %c0_i32_1 = arith.constant 0 : i32
    return %c0_i32, %c0_i32_0 : i32, i32
  }
  func.func @transform_3(%arg0: i32) -> (i32, i32) {
    %c0_i32 = arith.constant 0 : i32
    %c0_i32_0 = arith.constant 0 : i32
    %c0_i32_1 = arith.constant 0 : i32
    return %c0_i32, %c0_i32_0 : i32, i32
  }
  func.func @transform_4(%arg0: i32) -> (i32, i32) {
    %c0_i32 = arith.constant 0 : i32
    %c0_i32_0 = arith.constant 0 : i32
    %c0_i32_1 = arith.constant 0 : i32
    return %c0_i32, %c0_i32_0 : i32, i32
  }
  func.func @transform_5(%arg0: i32) -> (i32, i32) {
    %c0_i32 = arith.constant 0 : i32
    %c0_i32_0 = arith.constant 0 : i32
    return %arg0, %c0_i32 : i32, i32
  }
}

</mosaic_0001>

<bundles_post_ra>
// kernel: born_mvn_forward_prepared.1
= control target key start
LH: loop header
LB: loop body
LE: loop exit
PB: predicated region body
PF: predicated region fallthrough
CT: control target
= control target key end

     0   :  { %10 = vsyncpa [#allocation3], 0  ;;  %s1836_s21 = smov [#allocation2]   ;;  %s1837_s23 = smov 1024   ;;  %s2784_s0 = inlined_call_operand.vmem [shape: f32[1,512], index: 0, kind: input, shape index: {}]   ;;  %s2785_s1 = inlined_call_operand.hbm [shape: f32[256,1024], index: 1, kind: input, shape index: {}]   ;;  %s2786_s2 = inlined_call_operand.vmem [shape: f32[1,1024], index: 2, kind: input, shape index: {}]   ;;  %s2787_s3 = inlined_call_operand.vmem [shape: f32[1024,64], index: 3, kind: input, shape index: {}]   ;;  %s2788_s4 = inlined_call_operand.vmem [shape: f32[1,64], index: 4, kind: input, shape index: {}]   ;;  %s2789_s5 = inlined_call_operand.vmem [shape: f32[1,128], index: 5, kind: output, shape index: {}]  }
   0x1   :  { %s17_s20 = sshll.u32 %s2785_s1, 4  ;;  %s19_s22 = sshll.u32 %s1836_s21, 4  ;;  %s18_s20 = int_to_ptr.hbm [resolvable:$true] %s17_s20  ;;  %s20_s22 = int_to_ptr.vmem [resolvable:$true] %s19_s22 }
   0x2   :  { %s1838_s24 = smov 64  }
   0x3   :  { %25 = dma.hbm_to_vmem [thread:$0]  %s18_s20, 32768, %s20_s22, [#allocation3], %s1837_s23, %s1837_s23, %s1838_s24  }
   0x4   :  { %1834 = dma.done.wait [#allocation3], 32768  }
   0x5   :  { %1835 = vsyncadd [#allocation3], 4294934528  ;;  %v156_v0 = vld [vmem:[#allocation2 + $0x3c0] sm:$0xff]  ;;  %v157_v2 = vld [vmem:[#allocation2 + $0x3c8] sm:$0xff]  ;;  %vm1447_vm0 = vcmask 523264  }
   0x6   :  { %v284_v1 = vld [vmem:[#allocation2 + $0x7c0] sm:$0xff]  ;;  %428 = vmatpush.msra.mxu0 %v156_v0  ;;  %v285_v3 = vld [vmem:[#allocation2 + $0x7c8] sm:$0xff]  ;;  %468 = vmatpush.msra.mxu2 %v157_v2  ;;  %v158_v0 = vld [vmem:[#allocation2 + $0x3d0] sm:$0xff] }
   0x7   :  { %448 = vmatpush.msra.mxu1 %v284_v1  ;;  %v148_v4 = vld [vmem:[#allocation2 + $0x380] sm:$0xff]  ;;  %488 = vmatpush.msra.mxu3 %v285_v3  ;;  %v149_v6 = vld [vmem:[#allocation2 + $0x388] sm:$0xff]  ;;  %v286_v1 = vld [vmem:[#allocation2 + $0x7d0] sm:$0xff] }
   0x8   :  { %v276_v5 = vld [vmem:[#allocation2 + $0x780] sm:$0xff]  ;;  %v277_v7 = vld [vmem:[#allocation2 + $0x788] sm:$0xff]  ;;  %429 = vmatpush.msra.mxu0 %v148_v4  ;;  %469 = vmatpush.msra.mxu2 %v149_v6  ;;  %v159_v2 = vld [vmem:[#allocation2 + $0x3d8] sm:$0xff] }
   0x9   :  { %v140_v8 = vld [vmem:[#allocation2 + $0x340] sm:$0xff]  ;;  %449 = vmatpush.msra.mxu1 %v276_v5  ;;  %v141_v10 = vld [vmem:[#allocation2 + $0x348] sm:$0xff]  ;;  %489 = vmatpush.msra.mxu3 %v277_v7  ;;  %v287_v3 = vld [vmem:[#allocation2 + $0x7d8] sm:$0xff] }
   0xa   :  { %v268_v9 = vld [vmem:[#allocation2 + $0x740] sm:$0xff]  ;;  %v269_v11 = vld [vmem:[#allocation2 + $0x748] sm:$0xff]  ;;  %430 = vmatpush.msra.mxu0 %v140_v8  ;;  %470 = vmatpush.msra.mxu2 %v141_v10  ;;  %v150_v4 = vld [vmem:[#allocation2 + $0x390] sm:$0xff] }
   0xb   :  { %v132_v12 = vld [vmem:[#allocation2 + $0x300] sm:$0xff]  ;;  %450 = vmatpush.msra.mxu1 %v268_v9  ;;  %v133_v14 = vld [vmem:[#allocation2 + $0x308] sm:$0xff]  ;;  %490 = vmatpush.msra.mxu3 %v269_v11  ;;  %v278_v5 = vld [vmem:[#allocation2 + $0x790] sm:$0xff] }
   0xc   :  { %v260_v13 = vld [vmem:[#allocation2 + $0x700] sm:$0xff]  ;;  %v261_v15 = vld [vmem:[#allocation2 + $0x708] sm:$0xff]  ;;  %431 = vmatpush.msra.mxu0 %v132_v12  ;;  %471 = vmatpush.msra.mxu2 %v133_v14  ;;  %v151_v6 = vld [vmem:[#allocation2 + $0x398] sm:$0xff] }
   0xd   :  { %v124_v16 = vld [vmem:[#allocation2 + $0x2c0] sm:$0xff]  ;;  %451 = vmatpush.msra.mxu1 %v260_v13  ;;  %v125_v18 = vld [vmem:[#allocation2 + $0x2c8] sm:$0xff]  ;;  %491 = vmatpush.msra.mxu3 %v261_v15  ;;  %v279_v7 = vld [vmem:[#allocation2 + $0x798] sm:$0xff] }
   0xe   :  { %v252_v17 = vld [vmem:[#allocation2 + $0x6c0] sm:$0xff]  ;;  %v253_v19 = vld [vmem:[#allocation2 + $0x6c8] sm:$0xff]  ;;  %432 = vmatpush.msra.mxu0 %v124_v16  ;;  %472 = vmatpush.msra.mxu2 %v125_v18  ;;  %v142_v8 = vld [vmem:[#allocation2 + $0x350] sm:$0xff] }
   0xf   :  { %v116_v20 = vld [vmem:[#allocation2 + $0x280] sm:$0xff]  ;;  %452 = vmatpush.msra.mxu1 %v252_v17  ;;  %v117_v22 = vld [vmem:[#allocation2 + $0x288] sm:$0xff]  ;;  %492 = vmatpush.msra.mxu3 %v253_v19  ;;  %v270_v9 = vld [vmem:[#allocation2 + $0x750] sm:$0xff] }
  0x10   :  { %v244_v21 = vld [vmem:[#allocation2 + $0x680] sm:$0xff]  ;;  %v245_v23 = vld [vmem:[#allocation2 + $0x688] sm:$0xff]  ;;  %433 = vmatpush.msra.mxu0 %v116_v20  ;;  %473 = vmatpush.msra.mxu2 %v117_v22  ;;  %v143_v10 = vld [vmem:[#allocation2 + $0x358] sm:$0xff] }
  0x11   :  { %v108_v24 = vld [vmem:[#allocation2 + $0x240] sm:$0xff]  ;;  %453 = vmatpush.msra.mxu1 %v244_v21  ;;  %v109_v26 = vld [vmem:[#allocation2 + $0x248] sm:$0xff]  ;;  %493 = vmatpush.msra.mxu3 %v245_v23  ;;  %v271_v11 = vld [vmem:[#allocation2 + $0x758] sm:$0xff] }
  0x12   :  { %v236_v25 = vld [vmem:[#allocation2 + $0x640] sm:$0xff]  ;;  %v237_v27 = vld [vmem:[#allocation2 + $0x648] sm:$0xff]  ;;  %434 = vmatpush.msra.mxu0 %v108_v24  ;;  %474 = vmatpush.msra.mxu2 %v109_v26  ;;  %v134_v12 = vld [vmem:[#allocation2 + $0x310] sm:$0xff] }
  0x13   :  { %v100_v28 = vld [vmem:[#allocation2 + $0x200] sm:$0xff]  ;;  %454 = vmatpush.msra.mxu1 %v236_v25  ;;  %v101_v30 = vld [vmem:[#allocation2 + $0x208] sm:$0xff]  ;;  %494 = vmatpush.msra.mxu3 %v237_v27  ;;  %v262_v13 = vld [vmem:[#allocation2 + $0x710] sm:$0xff] }
  0x14   :  { %v228_v29 = vld [vmem:[#allocation2 + $0x600] sm:$0xff]  ;;  %v229_v31 = vld [vmem:[#allocation2 + $0x608] sm:$0xff]  ;;  %435 = vmatpush.msra.mxu0 %v100_v28  ;;  %475 = vmatpush.msra.mxu2 %v101_v30  ;;  %v135_v14 = vld [vmem:[#allocation2 + $0x318] sm:$0xff] }
  0x15   :  { %v92_v32 = vld [vmem:[#allocation2 + $0x1c0] sm:$0xff]  ;;  %455 = vmatpush.msra.mxu1 %v228_v29  ;;  %v93_v34 = vld [vmem:[#allocation2 + $0x1c8] sm:$0xff]  ;;  %495 = vmatpush.msra.mxu3 %v229_v31  ;;  %v263_v15 = vld [vmem:[#allocation2 + $0x718] sm:$0xff] }
  0x16   :  { %v220_v33 = vld [vmem:[#allocation2 + $0x5c0] sm:$0xff]  ;;  %v221_v35 = vld [vmem:[#allocation2 + $0x5c8] sm:$0xff]  ;;  %436 = vmatpush.msra.mxu0 %v92_v32  ;;  %476 = vmatpush.msra.mxu2 %v93_v34  ;;  %v126_v16 = vld [vmem:[#allocation2 + $0x2d0] sm:$0xff] }
  0x17   :  { %v84_v36 = vld [vmem:[#allocation2 + $0x180] sm:$0xff]  ;;  %456 = vmatpush.msra.mxu1 %v220_v33  ;;  %v85_v38 = vld [vmem:[#allocation2 + $0x188] sm:$0xff]  ;;  %496 = vmatpush.msra.mxu3 %v221_v35  ;;  %v254_v17 = vld [vmem:[#allocation2 + $0x6d0] sm:$0xff] }
  0x18   :  { %v212_v37 = vld [vmem:[#allocation2 + $0x580] sm:$0xff]  ;;  %v213_v39 = vld [vmem:[#allocation2 + $0x588] sm:$0xff]  ;;  %437 = vmatpush.msra.mxu0 %v84_v36  ;;  %477 = vmatpush.msra.mxu2 %v85_v38  ;;  %v127_v18 = vld [vmem:[#allocation2 + $0x2d8] sm:$0xff] }
  0x19   :  { %v76_v40 = vld [vmem:[#allocation2 + $0x140] sm:$0xff]  ;;  %457 = vmatpush.msra.mxu1 %v212_v37  ;;  %v77_v42 = vld [vmem:[#allocation2 + $0x148] sm:$0xff]  ;;  %497 = vmatpush.msra.mxu3 %v213_v39  ;;  %v255_v19 = vld [vmem:[#allocation2 + $0x6d8] sm:$0xff] }
  0x1a   :  { %v204_v41 = vld [vmem:[#allocation2 + $0x540] sm:$0xff]  ;;  %v205_v43 = vld [vmem:[#allocation2 + $0x548] sm:$0xff]  ;;  %438 = vmatpush.msra.mxu0 %v76_v40  ;;  %478 = vmatpush.msra.mxu2 %v77_v42  ;;  %v118_v20 = vld [vmem:[#allocation2 + $0x290] sm:$0xff] }
  0x1b   :  { %v68_v44 = vld [vmem:[#allocation2 + $0x100] sm:$0xff]  ;;  %458 = vmatpush.msra.mxu1 %v204_v41  ;;  %v69_v46 = vld [vmem:[#allocation2 + $0x108] sm:$0xff]  ;;  %498 = vmatpush.msra.mxu3 %v205_v43  ;;  %v246_v21 = vld [vmem:[#allocation2 + $0x690] sm:$0xff] }
  0x1c   :  { %v196_v45 = vld [vmem:[#allocation2 + $0x500] sm:$0xff]  ;;  %v197_v47 = vld [vmem:[#allocation2 + $0x508] sm:$0xff]  ;;  %439 = vmatpush.msra.mxu0 %v68_v44  ;;  %479 = vmatpush.msra.mxu2 %v69_v46  ;;  %v119_v22 = vld [vmem:[#allocation2 + $0x298] sm:$0xff] }
  0x1d   :  { %v60_v48 = vld [vmem:[#allocation2 + $0xc0] sm:$0xff]  ;;  %459 = vmatpush.msra.mxu1 %v196_v45  ;;  %v61_v50 = vld [vmem:[#allocation2 + $0xc8] sm:$0xff]  ;;  %499 = vmatpush.msra.mxu3 %v197_v47  ;;  %v247_v23 = vld [vmem:[#allocation2 + $0x698] sm:$0xff] }
  0x1e   :  { %v188_v49 = vld [vmem:[#allocation2 + $0x4c0] sm:$0xff]  ;;  %v189_v51 = vld [vmem:[#allocation2 + $0x4c8] sm:$0xff]  ;;  %440 = vmatpush.msra.mxu0 %v60_v48  ;;  %480 = vmatpush.msra.mxu2 %v61_v50  ;;  %v110_v24 = vld [vmem:[#allocation2 + $0x250] sm:$0xff] }
  0x1f   :  { %v52_v52 = vld [vmem:[#allocation2 + $0x80] sm:$0xff]  ;;  %460 = vmatpush.msra.mxu1 %v188_v49  ;;  %v53_v54 = vld [vmem:[#allocation2 + $0x88] sm:$0xff]  ;;  %500 = vmatpush.msra.mxu3 %v189_v51  ;;  %v238_v25 = vld [vmem:[#allocation2 + $0x650] sm:$0xff] }
  0x20   :  { %v180_v53 = vld [vmem:[#allocation2 + $0x480] sm:$0xff]  ;;  %v181_v55 = vld [vmem:[#allocation2 + $0x488] sm:$0xff]  ;;  %441 = vmatpush.msra.mxu0 %v52_v52  ;;  %481 = vmatpush.msra.mxu2 %v53_v54  ;;  %v111_v26 = vld [vmem:[#allocation2 + $0x258] sm:$0xff] }
  0x21   :  { %v44_v56 = vld [vmem:[#allocation2 + $0x40] sm:$0xff]  ;;  %461 = vmatpush.msra.mxu1 %v180_v53  ;;  %v45_v58 = vld [vmem:[#allocation2 + $0x48] sm:$0xff]  ;;  %501 = vmatpush.msra.mxu3 %v181_v55  ;;  %v239_v27 = vld [vmem:[#allocation2 + $0x658] sm:$0xff] }
  0x22   :  { %v172_v57 = vld [vmem:[#allocation2 + $0x440] sm:$0xff]  ;;  %v173_v59 = vld [vmem:[#allocation2 + $0x448] sm:$0xff]  ;;  %442 = vmatpush.msra.mxu0 %v44_v56  ;;  %482 = vmatpush.msra.mxu2 %v45_v58  ;;  %v102_v28 = vld [vmem:[#allocation2 + $0x210] sm:$0xff] }
  0x23   :  { %v36_v60 = vld [vmem:[#allocation2] sm:$0xff]  ;;  %462 = vmatpush.msra.mxu1 %v172_v57  ;;  %v37_v62 = vld [vmem:[#allocation2 + $0x8] sm:$0xff]  ;;  %502 = vmatpush.msra.mxu3 %v173_v59  ;;  %v230_v29 = vld [vmem:[#allocation2 + $0x610] sm:$0xff] }
  0x24   :  { %v164_v61 = vld [vmem:[#allocation2 + $0x400] sm:$0xff]  ;;  %v165_v63 = vld [vmem:[#allocation2 + $0x408] sm:$0xff]  ;;  %443 = vmatpush.msra.mxu0 %v36_v60  ;;  %483 = vmatpush.msra.mxu2 %v37_v62  ;;  %v103_v30 = vld [vmem:[#allocation2 + $0x218] sm:$0xff] }
  0x25   :  { %463 = vmatpush.msra.mxu1 %v164_v61  ;;  %503 = vmatpush.msra.mxu3 %v165_v63  ;;  %v231_v31 = vld [vmem:[#allocation2 + $0x618] sm:$0xff]  ;;  %v94_v32 = vld [vmem:[#allocation2 + $0x1d0] sm:$0xff]  ;;  %v422_v42 = vld [vmem:[%s2784_s0] sm:$0x3] }
  0x26   :  { %508 = vmatpush.msrb.mxu0 %v158_v0  ;;  %548 = vmatpush.msrb.mxu2 %v159_v2  ;;  %v222_v33 = vld [vmem:[#allocation2 + $0x5d0] sm:$0xff]  ;;  %v95_v34 = vld [vmem:[#allocation2 + $0x1d8] sm:$0xff]  ;;  %v1876_v49 = vperm.slane %v422_v42, 0  ;;  %v1878_v50 = vperm.slane %v422_v42, 1  ;;  %v217_v42 = vld [vmem:[#allocation2 + $0x5a8] sm:$0xff] }
  0x27   :  { %528 = vmatpush.msrb.mxu1 %v286_v1  ;;  %568 = vmatpush.msrb.mxu3 %v287_v3  ;;  %v223_v35 = vld [vmem:[#allocation2 + $0x5d8] sm:$0xff]  ;;  %v86_v36 = vld [vmem:[#allocation2 + $0x190] sm:$0xff]  ;;  %v160_v3 = vld [vmem:[#allocation2 + $0x3e0] sm:$0xff] }
  0x28   :  { %509 = vmatpush.msrb.mxu0 %v150_v4  ;;  %549 = vmatpush.msrb.mxu2 %v151_v6  ;;  %v214_v37 = vld [vmem:[#allocation2 + $0x590] sm:$0xff]  ;;  %v87_v38 = vld [vmem:[#allocation2 + $0x198] sm:$0xff]  ;;  %v288_v4 = vld [vmem:[#allocation2 + $0x7e0] sm:$0xff] }
  0x29   :  { %529 = vmatpush.msrb.mxu1 %v278_v5  ;;  %569 = vmatpush.msrb.mxu3 %v279_v7  ;;  %v215_v39 = vld [vmem:[#allocation2 + $0x598] sm:$0xff]  ;;  %v78_v40 = vld [vmem:[#allocation2 + $0x150] sm:$0xff]  ;;  %v161_v5 = vld [vmem:[#allocation2 + $0x3e8] sm:$0xff] }
  0x2a   :  { %510 = vmatpush.msrb.mxu0 %v142_v8  ;;  %550 = vmatpush.msrb.mxu2 %v143_v10  ;;  %v206_v41 = vld [vmem:[#allocation2 + $0x550] sm:$0xff]  ;;  %v79_v43 = vld [vmem:[#allocation2 + $0x158] sm:$0xff]  ;;  %v289_v6 = vld [vmem:[#allocation2 + $0x7e8] sm:$0xff] }
  0x2b   :  { %530 = vmatpush.msrb.mxu1 %v270_v9  ;;  %570 = vmatpush.msrb.mxu3 %v271_v11  ;;  %v207_v44 = vld [vmem:[#allocation2 + $0x558] sm:$0xff]  ;;  %v70_v45 = vld [vmem:[#allocation2 + $0x110] sm:$0xff]  ;;  %v152_v7 = vld [vmem:[#allocation2 + $0x3a0] sm:$0xff] }
  0x2c   :  { %511 = vmatpush.msrb.mxu0 %v134_v12  ;;  %551 = vmatpush.msrb.mxu2 %v135_v14  ;;  %v198_v46 = vld [vmem:[#allocation2 + $0x510] sm:$0xff]  ;;  %v71_v47 = vld [vmem:[#allocation2 + $0x118] sm:$0xff]  ;;  %v280_v8 = vld [vmem:[#allocation2 + $0x7a0] sm:$0xff] }
  0x2d   :  { %531 = vmatpush.msrb.mxu1 %v262_v13  ;;  %571 = vmatpush.msrb.mxu3 %v263_v15  ;;  %v199_v48 = vld [vmem:[#allocation2 + $0x518] sm:$0xff]  ;;  %v62_v51 = vld [vmem:[#allocation2 + $0xd0] sm:$0xff]  ;;  %v153_v9 = vld [vmem:[#allocation2 + $0x3a8] sm:$0xff] }
  0x2e   :  { %512 = vmatpush.msrb.mxu0 %v126_v16  ;;  %552 = vmatpush.msrb.mxu2 %v127_v18  ;;  %v190_v52 = vld [vmem:[#allocation2 + $0x4d0] sm:$0xff]  ;;  %v63_v53 = vld [vmem:[#allocation2 + $0xd8] sm:$0xff]  ;;  %v281_v10 = vld [vmem:[#allocation2 + $0x7a8] sm:$0xff] }
  0x2f   :  { %532 = vmatpush.msrb.mxu1 %v254_v17  ;;  %572 = vmatpush.msrb.mxu3 %v255_v19  ;;  %v191_v54 = vld [vmem:[#allocation2 + $0x4d8] sm:$0xff]  ;;  %v54_v55 = vld [vmem:[#allocation2 + $0x90] sm:$0xff]  ;;  %v144_v11 = vld [vmem:[#allocation2 + $0x360] sm:$0xff] }
  0x30   :  { %513 = vmatpush.msrb.mxu0 %v118_v20  ;;  %553 = vmatpush.msrb.mxu2 %v119_v22  ;;  %v182_v56 = vld [vmem:[#allocation2 + $0x490] sm:$0xff]  ;;  %v55_v57 = vld [vmem:[#allocation2 + $0x98] sm:$0xff]  ;;  %v272_v12 = vld [vmem:[#allocation2 + $0x760] sm:$0xff] }
  0x31   :  { %533 = vmatpush.msrb.mxu1 %v246_v21  ;;  %573 = vmatpush.msrb.mxu3 %v247_v23  ;;  %v183_v58 = vld [vmem:[#allocation2 + $0x498] sm:$0xff]  ;;  %v46_v59 = vld [vmem:[#allocation2 + $0x50] sm:$0xff]  ;;  %v145_v13 = vld [vmem:[#allocation2 + $0x368] sm:$0xff] }
  0x32   :  { %514 = vmatpush.msrb.mxu0 %v110_v24  ;;  %554 = vmatpush.msrb.mxu2 %v111_v26  ;;  %v174_v60 = vld [vmem:[#allocation2 + $0x450] sm:$0xff]  ;;  %v47_v61 = vld [vmem:[#allocation2 + $0x58] sm:$0xff]  ;;  %v273_v14 = vld [vmem:[#allocation2 + $0x768] sm:$0xff] }
  0x33   :  { %534 = vmatpush.msrb.mxu1 %v238_v25  ;;  %574 = vmatpush.msrb.mxu3 %v239_v27  ;;  %v175_v62 = vld [vmem:[#allocation2 + $0x458] sm:$0xff]  ;;  %v38_v63 = vld [vmem:[#allocation2 + $0x10] sm:$0xff]  ;;  %v136_v15 = vld [vmem:[#allocation2 + $0x320] sm:$0xff] }
  0x34   :  { %515 = vmatpush.msrb.mxu0 %v102_v28  ;;  %555 = vmatpush.msrb.mxu2 %v103_v30  ;;  %v166_v0 = vld [vmem:[#allocation2 + $0x410] sm:$0xff]  ;;  %v39_v1 = vld [vmem:[#allocation2 + $0x18] sm:$0xff]  ;;  %v264_v16 = vld [vmem:[#allocation2 + $0x720] sm:$0xff] }
  0x35   :  { %535 = vmatpush.msrb.mxu1 %v230_v29  ;;  %575 = vmatpush.msrb.mxu3 %v231_v31  ;;  %v167_v2 = vld [vmem:[#allocation2 + $0x418] sm:$0xff]  ;;  %v137_v17 = vld [vmem:[#allocation2 + $0x328] sm:$0xff]  ;;  %v128_v19 = vld [vmem:[#allocation2 + $0x2e0] sm:$0xff] }
  0x36   :  { %516 = vmatpush.msrb.mxu0 %v94_v32  ;;  %556 = vmatpush.msrb.mxu2 %v95_v34  ;;  %v265_v18 = vld [vmem:[#allocation2 + $0x728] sm:$0xff]  ;;  %v256_v20 = vld [vmem:[#allocation2 + $0x6e0] sm:$0xff] }
  0x37   :  { %536 = vmatpush.msrb.mxu1 %v222_v33  ;;  %576 = vmatpush.msrb.mxu3 %v223_v35  ;;  %v129_v21 = vld [vmem:[#allocation2 + $0x2e8] sm:$0xff]  ;;  %v120_v23 = vld [vmem:[#allocation2 + $0x2a0] sm:$0xff] }
  0x38   :  { %517 = vmatpush.msrb.mxu0 %v86_v36  ;;  %557 = vmatpush.msrb.mxu2 %v87_v38  ;;  %v257_v22 = vld [vmem:[#allocation2 + $0x6e8] sm:$0xff]  ;;  %v248_v24 = vld [vmem:[#allocation2 + $0x6a0] sm:$0xff] }
  0x39   :  { %537 = vmatpush.msrb.mxu1 %v214_v37  ;;  %577 = vmatpush.msrb.mxu3 %v215_v39  ;;  %v121_v25 = vld [vmem:[#allocation2 + $0x2a8] sm:$0xff]  ;;  %v112_v27 = vld [vmem:[#allocation2 + $0x260] sm:$0xff] }
  0x3a   :  { %518 = vmatpush.msrb.mxu0 %v78_v40  ;;  %558 = vmatpush.msrb.mxu2 %v79_v43  ;;  %v249_v26 = vld [vmem:[#allocation2 + $0x6a8] sm:$0xff]  ;;  %v240_v28 = vld [vmem:[#allocation2 + $0x660] sm:$0xff] }
  0x3b   :  { %538 = vmatpush.msrb.mxu1 %v206_v41  ;;  %578 = vmatpush.msrb.mxu3 %v207_v44  ;;  %v113_v29 = vld [vmem:[#allocation2 + $0x268] sm:$0xff]  ;;  %v104_v31 = vld [vmem:[#allocation2 + $0x220] sm:$0xff] }
  0x3c   :  { %519 = vmatpush.msrb.mxu0 %v70_v45  ;;  %559 = vmatpush.msrb.mxu2 %v71_v47  ;;  %v241_v30 = vld [vmem:[#allocation2 + $0x668] sm:$0xff]  ;;  %v232_v32 = vld [vmem:[#allocation2 + $0x620] sm:$0xff] }
  0x3d   :  { %539 = vmatpush.msrb.mxu1 %v198_v46  ;;  %579 = vmatpush.msrb.mxu3 %v199_v48  ;;  %v105_v33 = vld [vmem:[#allocation2 + $0x228] sm:$0xff]  ;;  %v96_v35 = vld [vmem:[#allocation2 + $0x1e0] sm:$0xff] }
  0x3e   :  { %484 = vmatmul.f32.vlgmr.msra.gmra.mxu2 %v1876_v49  ;;  %504 = vmatmul.f32.vlgmr.msra.gmra.mxu3 %v1878_v50  ;;  %v233_v34 = vld [vmem:[#allocation2 + $0x628] sm:$0xff]  ;;  %v224_v36 = vld [vmem:[#allocation2 + $0x5e0] sm:$0xff] }
  0x3f   :  { %520 = vmatpush.msrb.mxu0 %v62_v51  ;;  %540 = vmatpush.msrb.mxu1 %v190_v52  ;;  %v97_v37 = vld [vmem:[#allocation2 + $0x1e8] sm:$0xff]  ;;  %v88_v39 = vld [vmem:[#allocation2 + $0x1a0] sm:$0xff] }
  0x40   :  { %560 = vmatpush.msrb.mxu2 %v63_v53  ;;  %580 = vmatpush.msrb.mxu3 %v191_v54  ;;  %v225_v38 = vld [vmem:[#allocation2 + $0x5e8] sm:$0xff]  ;;  %v216_v40 = vld [vmem:[#allocation2 + $0x5a0] sm:$0xff] }
  0x41   :  { %444 = vmatmul.f32.vlgmr.msra.gmra.mxu0 %v1876_v49  ;;  %464 = vmatmul.f32.vlgmr.msra.gmra.mxu1 %v1878_v50  ;;  %v89_v41 = vld [vmem:[#allocation2 + $0x1a8] sm:$0xff]  ;;  %v80_v43 = vld [vmem:[#allocation2 + $0x160] sm:$0xff] }
  0x42   :  { %521 = vmatpush.msrb.mxu0 %v54_v55  ;;  %541 = vmatpush.msrb.mxu1 %v182_v56  ;;  %v208_v44 = vld [vmem:[#allocation2 + $0x560] sm:$0xff]  ;;  %v81_v45 = vld [vmem:[#allocation2 + $0x168] sm:$0xff] }
  0x43   :  { %561 = vmatpush.msrb.mxu2 %v55_v57  ;;  %581 = vmatpush.msrb.mxu3 %v183_v58  ;;  %v209_v46 = vld [vmem:[#allocation2 + $0x568] sm:$0xff]  ;;  %v72_v47 = vld [vmem:[#allocation2 + $0x120] sm:$0xff] }
  0x44   :  { %522 = vmatpush.msrb.mxu0 %v46_v59  ;;  %542 = vmatpush.msrb.mxu1 %v174_v60  ;;  %v200_v48 = vld [vmem:[#allocation2 + $0x520] sm:$0xff]  ;;  %v73_v51 = vld [vmem:[#allocation2 + $0x128] sm:$0xff] }
  0x45   :  { %562 = vmatpush.msrb.mxu2 %v47_v61  ;;  %582 = vmatpush.msrb.mxu3 %v175_v62  ;;  %v201_v52 = vld [vmem:[#allocation2 + $0x528] sm:$0xff]  ;;  %v64_v53 = vld [vmem:[#allocation2 + $0xe0] sm:$0xff] }
  0x46   :  { %523 = vmatpush.msrb.mxu0 %v38_v63  ;;  %543 = vmatpush.msrb.mxu1 %v166_v0  ;;  %v192_v54 = vld [vmem:[#allocation2 + $0x4e0] sm:$0xff]  ;;  %v65_v55 = vld [vmem:[#allocation2 + $0xe8] sm:$0xff] }
  0x47   :  { %563 = vmatpush.msrb.mxu2 %v39_v1  ;;  %583 = vmatpush.msrb.mxu3 %v167_v2  ;;  %v193_v56 = vld [vmem:[#allocation2 + $0x4e8] sm:$0xff]  ;;  %v56_v57 = vld [vmem:[#allocation2 + $0xa0] sm:$0xff] }
  0x48   :  { %564 = vmatmul.f32.vlgmr.msrb.gmra.mxu2 %v1876_v49  ;;  %584 = vmatmul.f32.vlgmr.msrb.gmra.mxu3 %v1878_v50  ;;  %v184_v58 = vld [vmem:[#allocation2 + $0x4a0] sm:$0xff]  ;;  %v57_v59 = vld [vmem:[#allocation2 + $0xa8] sm:$0xff] }
  0x49   :  { %588 = vmatpush.msra.mxu0 %v160_v3  ;;  %608 = vmatpush.msra.mxu1 %v288_v4  ;;  %v185_v60 = vld [vmem:[#allocation2 + $0x4a8] sm:$0xff]  ;;  %v48_v61 = vld [vmem:[#allocation2 + $0x60] sm:$0xff] }
  0x4a   :  { %628 = vmatpush.msra.mxu2 %v161_v5  ;;  %648 = vmatpush.msra.mxu3 %v289_v6  ;;  %v176_v62 = vld [vmem:[#allocation2 + $0x460] sm:$0xff]  ;;  %v49_v63 = vld [vmem:[#allocation2 + $0x68] sm:$0xff]  ;;  %v162_v5 = vld [vmem:[#allocation2 + $0x3f0] sm:$0xff] }
  0x4b   :  { %524 = vmatmul.f32.vlgmr.msrb.gmra.mxu0 %v1876_v49  ;;  %544 = vmatmul.f32.vlgmr.msrb.gmra.mxu1 %v1878_v50  ;;  %v177_v0 = vld [vmem:[#allocation2 + $0x468] sm:$0xff]  ;;  %v40_v1 = vld [vmem:[#allocation2 + $0x20] sm:$0xff]  ;;  %v290_v6 = vld [vmem:[#allocation2 + $0x7f0] sm:$0xff] }
  0x4c   :  { %589 = vmatpush.msra.mxu0 %v152_v7  ;;  %609 = vmatpush.msra.mxu1 %v280_v8  ;;  %v168_v2 = vld [vmem:[#allocation2 + $0x420] sm:$0xff]  ;;  %v41_v3 = vld [vmem:[#allocation2 + $0x28] sm:$0xff]  ;;  %v163_v7 = vld [vmem:[#allocation2 + $0x3f8] sm:$0xff] }
  0x4d   :  { %629 = vmatpush.msra.mxu2 %v153_v9  ;;  %649 = vmatpush.msra.mxu3 %v281_v10  ;;  %v169_v4 = vld [vmem:[#allocation2 + $0x428] sm:$0xff]  ;;  %v291_v8 = vld [vmem:[#allocation2 + $0x7f8] sm:$0xff]  ;;  %v154_v9 = vld [vmem:[#allocation2 + $0x3b0] sm:$0xff] }
  0x4e   :  { %590 = vmatpush.msra.mxu0 %v144_v11  ;;  %610 = vmatpush.msra.mxu1 %v272_v12  ;;  %v282_v10 = vld [vmem:[#allocation2 + $0x7b0] sm:$0xff]  ;;  %v155_v11 = vld [vmem:[#allocation2 + $0x3b8] sm:$0xff] }
  0x4f   :  { %630 = vmatpush.msra.mxu2 %v145_v13  ;;  %650 = vmatpush.msra.mxu3 %v273_v14  ;;  %v283_v12 = vld [vmem:[#allocation2 + $0x7b8] sm:$0xff]  ;;  %v146_v13 = vld [vmem:[#allocation2 + $0x370] sm:$0xff] }
  0x50   :  { %591 = vmatpush.msra.mxu0 %v136_v15  ;;  %611 = vmatpush.msra.mxu1 %v264_v16  ;;  %v274_v14 = vld [vmem:[#allocation2 + $0x770] sm:$0xff]  ;;  %v147_v15 = vld [vmem:[#allocation2 + $0x378] sm:$0xff] }
  0x51   :  { %631 = vmatpush.msra.mxu2 %v137_v17  ;;  %651 = vmatpush.msra.mxu3 %v265_v18  ;;  %v275_v16 = vld [vmem:[#allocation2 + $0x778] sm:$0xff]  ;;  %v138_v17 = vld [vmem:[#allocation2 + $0x330] sm:$0xff] }
  0x52   :  { %592 = vmatpush.msra.mxu0 %v128_v19  ;;  %612 = vmatpush.msra.mxu1 %v256_v20  ;;  %v266_v18 = vld [vmem:[#allocation2 + $0x730] sm:$0xff]  ;;  %v139_v19 = vld [vmem:[#allocation2 + $0x338] sm:$0xff] }
  0x53   :  { %632 = vmatpush.msra.mxu2 %v129_v21  ;;  %652 = vmatpush.msra.mxu3 %v257_v22  ;;  %v267_v20 = vld [vmem:[#allocation2 + $0x738] sm:$0xff]  ;;  %v130_v21 = vld [vmem:[#allocation2 + $0x2f0] sm:$0xff] }
  0x54   :  { %593 = vmatpush.msra.mxu0 %v120_v23  ;;  %613 = vmatpush.msra.mxu1 %v248_v24  ;;  %v258_v22 = vld [vmem:[#allocation2 + $0x6f0] sm:$0xff]  ;;  %v131_v23 = vld [vmem:[#allocation2 + $0x2f8] sm:$0xff] }
  0x55   :  { %633 = vmatpush.msra.mxu2 %v121_v25  ;;  %653 = vmatpush.msra.mxu3 %v249_v26  ;;  %v259_v24 = vld [vmem:[#allocation2 + $0x6f8] sm:$0xff]  ;;  %v122_v25 = vld [vmem:[#allocation2 + $0x2b0] sm:$0xff] }
  0x56   :  { %594 = vmatpush.msra.mxu0 %v112_v27  ;;  %614 = vmatpush.msra.mxu1 %v240_v28  ;;  %v250_v26 = vld [vmem:[#allocation2 + $0x6b0] sm:$0xff]  ;;  %v123_v27 = vld [vmem:[#allocation2 + $0x2b8] sm:$0xff] }
  0x57   :  { %634 = vmatpush.msra.mxu2 %v113_v29  ;;  %654 = vmatpush.msra.mxu3 %v241_v30  ;;  %v251_v28 = vld [vmem:[#allocation2 + $0x6b8] sm:$0xff]  ;;  %v114_v29 = vld [vmem:[#allocation2 + $0x270] sm:$0xff] }
  0x58   :  { %595 = vmatpush.msra.mxu0 %v104_v31  ;;  %615 = vmatpush.msra.mxu1 %v232_v32  ;;  %v242_v30 = vld [vmem:[#allocation2 + $0x670] sm:$0xff]  ;;  %v115_v31 = vld [vmem:[#allocation2 + $0x278] sm:$0xff] }
  0x59   :  { %635 = vmatpush.msra.mxu2 %v105_v33  ;;  %655 = vmatpush.msra.mxu3 %v233_v34  ;;  %v243_v32 = vld [vmem:[#allocation2 + $0x678] sm:$0xff]  ;;  %v106_v33 = vld [vmem:[#allocation2 + $0x230] sm:$0xff] }
  0x5a   :  { %596 = vmatpush.msra.mxu0 %v96_v35  ;;  %616 = vmatpush.msra.mxu1 %v224_v36  ;;  %v234_v34 = vld [vmem:[#allocation2 + $0x630] sm:$0xff]  ;;  %v107_v35 = vld [vmem:[#allocation2 + $0x238] sm:$0xff] }
  0x5b   :  { %636 = vmatpush.msra.mxu2 %v97_v37  ;;  %656 = vmatpush.msra.mxu3 %v225_v38  ;;  %v235_v36 = vld [vmem:[#allocation2 + $0x638] sm:$0xff]  ;;  %v98_v37 = vld [vmem:[#allocation2 + $0x1f0] sm:$0xff] }
  0x5c   :  { %597 = vmatpush.msra.mxu0 %v88_v39  ;;  %617 = vmatpush.msra.mxu1 %v216_v40  ;;  %v226_v38 = vld [vmem:[#allocation2 + $0x5f0] sm:$0xff]  ;;  %v99_v39 = vld [vmem:[#allocation2 + $0x1f8] sm:$0xff] }
  0x5d   :  { %637 = vmatpush.msra.mxu2 %v89_v41  ;;  %657 = vmatpush.msra.mxu3 %v217_v42  ;;  %v227_v40 = vld [vmem:[#allocation2 + $0x5f8] sm:$0xff]  ;;  %v90_v41 = vld [vmem:[#allocation2 + $0x1b0] sm:$0xff] }
  0x5e   :  { %598 = vmatpush.msra.mxu0 %v80_v43  ;;  %618 = vmatpush.msra.mxu1 %v208_v44  ;;  %v218_v42 = vld [vmem:[#allocation2 + $0x5b0] sm:$0xff]  ;;  %v91_v43 = vld [vmem:[#allocation2 + $0x1b8] sm:$0xff] }
  0x5f   :  { %638 = vmatpush.msra.mxu2 %v81_v45  ;;  %658 = vmatpush.msra.mxu3 %v209_v46  ;;  %v219_v44 = vld [vmem:[#allocation2 + $0x5b8] sm:$0xff]  ;;  %v82_v45 = vld [vmem:[#allocation2 + $0x170] sm:$0xff] }
  0x60   :  { %599 = vmatpush.msra.mxu0 %v72_v47  ;;  %619 = vmatpush.msra.mxu1 %v200_v48  ;;  %v210_v46 = vld [vmem:[#allocation2 + $0x570] sm:$0xff]  ;;  %v83_v47 = vld [vmem:[#allocation2 + $0x178] sm:$0xff] }
  0x61   :  { %639 = vmatpush.msra.mxu2 %v73_v51  ;;  %659 = vmatpush.msra.mxu3 %v201_v52  ;;  %v211_v48 = vld [vmem:[#allocation2 + $0x578] sm:$0xff]  ;;  %v74_v51 = vld [vmem:[#allocation2 + $0x130] sm:$0xff] }
  0x62   :  { %600 = vmatpush.msra.mxu0 %v64_v53  ;;  %620 = vmatpush.msra.mxu1 %v192_v54  ;;  %v202_v52 = vld [vmem:[#allocation2 + $0x530] sm:$0xff]  ;;  %v75_v53 = vld [vmem:[#allocation2 + $0x138] sm:$0xff] }
  0x63   :  { %640 = vmatpush.msra.mxu2 %v65_v55  ;;  %660 = vmatpush.msra.mxu3 %v193_v56  ;;  %v203_v54 = vld [vmem:[#allocation2 + $0x538] sm:$0xff]  ;;  %v66_v55 = vld [vmem:[#allocation2 + $0xf0] sm:$0xff] }
  0x64   :  { %601 = vmatpush.msra.mxu0 %v56_v57  ;;  %621 = vmatpush.msra.mxu1 %v184_v58  ;;  %v194_v56 = vld [vmem:[#allocation2 + $0x4f0] sm:$0xff]  ;;  %v67_v57 = vld [vmem:[#allocation2 + $0xf8] sm:$0xff] }
  0x65   :  { %641 = vmatpush.msra.mxu2 %v57_v59  ;;  %661 = vmatpush.msra.mxu3 %v185_v60  ;;  %v195_v58 = vld [vmem:[#allocation2 + $0x4f8] sm:$0xff]  ;;  %v58_v59 = vld [vmem:[#allocation2 + $0xb0] sm:$0xff] }
  0x66   :  { %602 = vmatpush.msra.mxu0 %v48_v61  ;;  %622 = vmatpush.msra.mxu1 %v176_v62  ;;  %v186_v60 = vld [vmem:[#allocation2 + $0x4b0] sm:$0xff]  ;;  %v59_v61 = vld [vmem:[#allocation2 + $0xb8] sm:$0xff] }
  0x67   :  { %642 = vmatpush.msra.mxu2 %v49_v63  ;;  %662 = vmatpush.msra.mxu3 %v177_v0  ;;  %v187_v62 = vld [vmem:[#allocation2 + $0x4b8] sm:$0xff]  ;;  %v50_v63 = vld [vmem:[#allocation2 + $0x70] sm:$0xff] }
  0x68   :  { %603 = vmatpush.msra.mxu0 %v40_v1  ;;  %623 = vmatpush.msra.mxu1 %v168_v2  ;;  %v178_v0 = vld [vmem:[#allocation2 + $0x470] sm:$0xff]  ;;  %v51_v1 = vld [vmem:[#allocation2 + $0x78] sm:$0xff] }
  0x69   :  { %643 = vmatpush.msra.mxu2 %v41_v3  ;;  %663 = vmatpush.msra.mxu3 %v169_v4  ;;  %v179_v2 = vld [vmem:[#allocation2 + $0x478] sm:$0xff]  ;;  %v42_v3 = vld [vmem:[#allocation2 + $0x30] sm:$0xff] }
  0x6a   :  { %604 = vmatmul.f32.vlgmr.msra.gmra.mxu0 %v1876_v49  ;;  %624 = vmatmul.f32.vlgmr.msra.gmra.mxu1 %v1878_v50  ;;  %v170_v4 = vld [vmem:[#allocation2 + $0x430] sm:$0xff] }
  0x6b   :  { %644 = vmatmul.f32.vlgmr.msra.gmra.mxu2 %v1876_v49  ;;  %664 = vmatmul.f32.vlgmr.msra.gmra.mxu3 %v1878_v50 }
  0x6c   :  { %668 = vmatpush.msrb.mxu0 %v162_v5  ;;  %688 = vmatpush.msrb.mxu1 %v290_v6  ;;  %v43_v5 = vld [vmem:[#allocation2 + $0x38] sm:$0xff] }
  0x6d   :  { %708 = vmatpush.msrb.mxu2 %v163_v7  ;;  %728 = vmatpush.msrb.mxu3 %v291_v8  ;;  %v171_v6 = vld [vmem:[#allocation2 + $0x438] sm:$0xff] }
  0x6e   :  { %669 = vmatpush.msrb.mxu0 %v154_v9  ;;  %689 = vmatpush.msrb.mxu1 %v282_v10  ;;  %v308_v7 = vld [vmem:[%s2787_s3 + $0x78] sm:$0xff] }
  0x6f   :  { %709 = vmatpush.msrb.mxu2 %v155_v11  ;;  %729 = vmatpush.msrb.mxu3 %v283_v12  ;;  %v324_v8 = vld [vmem:[%s2787_s3 + $0xf8] sm:$0xff]  ;;  %v307_v11 = vld [vmem:[%s2787_s3 + $0x70] sm:$0xff] }
  0x70   :  { %670 = vmatpush.msrb.mxu0 %v146_v13  ;;  %690 = vmatpush.msrb.mxu1 %v274_v14  ;;  %v340_v9 = vld [vmem:[%s2787_s3 + $0x178] sm:$0xff]  ;;  %v323_v12 = vld [vmem:[%s2787_s3 + $0xf0] sm:$0xff]  ;;  %v322_v14 = vld [vmem:[%s2787_s3 + $0xe8] sm:$0xff] }
  0x71   :  { %710 = vmatpush.msrb.mxu2 %v147_v15  ;;  %730 = vmatpush.msrb.mxu3 %v275_v16  ;;  %v356_v10 = vld [vmem:[%s2787_s3 + $0x1f8] sm:$0xff]  ;;  %v339_v13 = vld [vmem:[%s2787_s3 + $0x170] sm:$0xff]  ;;  %v338_v15 = vld [vmem:[%s2787_s3 + $0x168] sm:$0xff] }
  0x72   :  { %671 = vmatpush.msrb.mxu0 %v138_v17  ;;  %691 = vmatpush.msrb.mxu1 %v266_v18  ;;  %v354_v16 = vld [vmem:[%s2787_s3 + $0x1e8] sm:$0xff]  ;;  %v305_v17 = vld [vmem:[%s2787_s3 + $0x60] sm:$0xff] }
  0x73   :  { %711 = vmatpush.msrb.mxu2 %v139_v19  ;;  %731 = vmatpush.msrb.mxu3 %v267_v20  ;;  %v321_v18 = vld [vmem:[%s2787_s3 + $0xe0] sm:$0xff] }
  0x74   :  { %672 = vmatpush.msrb.mxu0 %v130_v21  ;;  %692 = vmatpush.msrb.mxu1 %v258_v22  ;;  %v337_v19 = vld [vmem:[%s2787_s3 + $0x160] sm:$0xff]  ;;  %v304_v21 = vld [vmem:[%s2787_s3 + $0x58] sm:$0xff] }
  0x75   :  { %712 = vmatpush.msrb.mxu2 %v131_v23  ;;  %732 = vmatpush.msrb.mxu3 %v259_v24  ;;  %v353_v20 = vld [vmem:[%s2787_s3 + $0x1e0] sm:$0xff]  ;;  %v320_v22 = vld [vmem:[%s2787_s3 + $0xd8] sm:$0xff] }
  0x76   :  { %673 = vmatpush.msrb.mxu0 %v122_v25  ;;  %693 = vmatpush.msrb.mxu1 %v250_v26  ;;  %v336_v23 = vld [vmem:[%s2787_s3 + $0x158] sm:$0xff]  ;;  %v303_v25 = vld [vmem:[%s2787_s3 + $0x50] sm:$0xff] }
  0x77   :  { %713 = vmatpush.msrb.mxu2 %v123_v27  ;;  %733 = vmatpush.msrb.mxu3 %v251_v28  ;;  %v352_v24 = vld [vmem:[%s2787_s3 + $0x1d8] sm:$0xff]  ;;  %v319_v26 = vld [vmem:[%s2787_s3 + $0xd0] sm:$0xff] }
  0x78   :  { %674 = vmatpush.msrb.mxu0 %v114_v29  ;;  %694 = vmatpush.msrb.mxu1 %v242_v30  ;;  %v335_v27 = vld [vmem:[%s2787_s3 + $0x150] sm:$0xff]  ;;  %v302_v29 = vld [vmem:[%s2787_s3 + $0x48] sm:$0xff] }
  0x79   :  { %714 = vmatpush.msrb.mxu2 %v115_v31  ;;  %734 = vmatpush.msrb.mxu3 %v243_v32  ;;  %v351_v28 = vld [vmem:[%s2787_s3 + $0x1d0] sm:$0xff]  ;;  %v318_v30 = vld [vmem:[%s2787_s3 + $0xc8] sm:$0xff]  ;;  %v301_v32 = vld [vmem:[%s2787_s3 + $0x40] sm:$0xff] }
  0x7a   :  { %675 = vmatpush.msrb.mxu0 %v106_v33  ;;  %695 = vmatpush.msrb.mxu1 %v234_v34  ;;  %v334_v31 = vld [vmem:[%s2787_s3 + $0x148] sm:$0xff]  ;;  %v317_v33 = vld [vmem:[%s2787_s3 + $0xc0] sm:$0xff] }
  0x7b   :  { %715 = vmatpush.msrb.mxu2 %v107_v35  ;;  %735 = vmatpush.msrb.mxu3 %v235_v36  ;;  %v333_v34 = vld [vmem:[%s2787_s3 + $0x140] sm:$0xff]  ;;  %v300_v35 = vld [vmem:[%s2787_s3 + $0x38] sm:$0xff] }
  0x7c   :  { %676 = vmatpush.msrb.mxu0 %v98_v37  ;;  %696 = vmatpush.msrb.mxu1 %v226_v38  ;;  %v316_v36 = vld [vmem:[%s2787_s3 + $0xb8] sm:$0xff]  ;;  %v299_v37 = vld [vmem:[%s2787_s3 + $0x30] sm:$0xff] }
  0x7d   :  { %716 = vmatpush.msrb.mxu2 %v99_v39  ;;  %736 = vmatpush.msrb.mxu3 %v227_v40  ;;  %v315_v38 = vld [vmem:[%s2787_s3 + $0xb0] sm:$0xff]  ;;  %v298_v39 = vld [vmem:[%s2787_s3 + $0x28] sm:$0xff] }
  0x7e   :  { %677 = vmatpush.msrb.mxu0 %v90_v41  ;;  %697 = vmatpush.msrb.mxu1 %v218_v42  ;;  %v314_v40 = vld [vmem:[%s2787_s3 + $0xa8] sm:$0xff]  ;;  %v297_v41 = vld [vmem:[%s2787_s3 + $0x20] sm:$0xff] }
  0x7f   :  { %717 = vmatpush.msrb.mxu2 %v91_v43  ;;  %737 = vmatpush.msrb.mxu3 %v219_v44  ;;  %v313_v42 = vld [vmem:[%s2787_s3 + $0xa0] sm:$0xff]  ;;  %v296_v43 = vld [vmem:[%s2787_s3 + $0x18] sm:$0xff] }
  0x80   :  { %678 = vmatpush.msrb.mxu0 %v82_v45  ;;  %698 = vmatpush.msrb.mxu1 %v210_v46  ;;  %v312_v44 = vld [vmem:[%s2787_s3 + $0x98] sm:$0xff]  ;;  %v350_v46 = vld [vmem:[%s2787_s3 + $0x1c8] sm:$0xff] }
  0x81   :  { %718 = vmatpush.msrb.mxu2 %v83_v47  ;;  %738 = vmatpush.msrb.mxu3 %v211_v48  ;;  %v332_v45 = vld [vmem:[%s2787_s3 + $0x138] sm:$0xff]  ;;  %v331_v47 = vld [vmem:[%s2787_s3 + $0x130] sm:$0xff]  ;;  %v349_v48 = vld [vmem:[%s2787_s3 + $0x1c0] sm:$0xff] }
  0x82   :  { %679 = vmatpush.msrb.mxu0 %v74_v51  ;;  %699 = vmatpush.msrb.mxu1 %v202_v52  ;;  %v295_v51 = vld [vmem:[%s2787_s3 + $0x10] sm:$0xff] }
  0x83   :  { %719 = vmatpush.msrb.mxu2 %v75_v53  ;;  %739 = vmatpush.msrb.mxu3 %v203_v54  ;;  %v311_v52 = vld [vmem:[%s2787_s3 + $0x90] sm:$0xff]  ;;  %v330_v53 = vld [vmem:[%s2787_s3 + $0x128] sm:$0xff]  ;;  %v348_v54 = vld [vmem:[%s2787_s3 + $0x1b8] sm:$0xff] }
  0x84   :  { %680 = vmatpush.msrb.mxu0 %v66_v55  ;;  %700 = vmatpush.msrb.mxu1 %v194_v56  ;;  %v294_v55 = vld [vmem:[%s2787_s3 + $0x8] sm:$0xff] }
  0x85   :  { %720 = vmatpush.msrb.mxu2 %v67_v57  ;;  %740 = vmatpush.msrb.mxu3 %v195_v58  ;;  %v310_v56 = vld [vmem:[%s2787_s3 + $0x88] sm:$0xff]  ;;  %v329_v57 = vld [vmem:[%s2787_s3 + $0x120] sm:$0xff]  ;;  %v347_v58 = vld [vmem:[%s2787_s3 + $0x1b0] sm:$0xff] }
  0x86   :  { %681 = vmatpush.msrb.mxu0 %v58_v59  ;;  %701 = vmatpush.msrb.mxu1 %v186_v60  ;;  %v293_v59 = vld [vmem:[%s2787_s3] sm:$0xff] }
  0x87   :  { %721 = vmatpush.msrb.mxu2 %v59_v61  ;;  %741 = vmatpush.msrb.mxu3 %v187_v62  ;;  %v309_v60 = vld [vmem:[%s2787_s3 + $0x80] sm:$0xff]  ;;  %v372_v61 = vld [vmem:[%s2787_s3 + $0x278] sm:$0xff] }
  0x88   :  { %682 = vmatpush.msrb.mxu0 %v50_v63  ;;  %702 = vmatpush.msrb.mxu1 %v178_v0  ;;  %v388_v62 = vld [vmem:[%s2787_s3 + $0x2f8] sm:$0xff]  ;;  %v371_v63 = vld [vmem:[%s2787_s3 + $0x270] sm:$0xff] }
  0x89   :  { %722 = vmatpush.msrb.mxu2 %v51_v1  ;;  %742 = vmatpush.msrb.mxu3 %v179_v2  ;;  %v387_v0 = vld [vmem:[%s2787_s3 + $0x2f0] sm:$0xff]  ;;  %v370_v1 = vld [vmem:[%s2787_s3 + $0x268] sm:$0xff]  ;;  %v328_v2 = vld [vmem:[%s2787_s3 + $0x118] sm:$0xff] }
  0x8a   :  { %683 = vmatpush.msrb.mxu0 %v42_v3  ;;  %703 = vmatpush.msrb.mxu1 %v170_v4  ;;  %v346_v3 = vld [vmem:[%s2787_s3 + $0x1a8] sm:$0xff] }
  0x8b   :  { %723 = vmatpush.msrb.mxu2 %v43_v5  ;;  %743 = vmatpush.msrb.mxu3 %v171_v6  ;;  %v386_v4 = vld [vmem:[%s2787_s3 + $0x2e8] sm:$0xff]  ;;  %v327_v5 = vld [vmem:[%s2787_s3 + $0x110] sm:$0xff]  ;;  %v345_v6 = vld [vmem:[%s2787_s3 + $0x1a0] sm:$0xff] }
  0x8c   :  { %684 = vmatmul.f32.vlgmr.msrb.gmra.mxu0 %v1876_v49  ;;  %704 = vmatmul.f32.vlgmr.msrb.gmra.mxu1 %v1878_v50 }
  0x8d   :  { %724 = vmatmul.f32.vlgmr.msrb.gmra.mxu2 %v1876_v49  ;;  %744 = vmatmul.f32.vlgmr.msrb.gmra.mxu3 %v1878_v50  ;;  %v355_v49 = vld [vmem:[%s2787_s3 + $0x1f0] sm:$0xff]  ;;  %v306_v50 = vld [vmem:[%s2787_s3 + $0x68] sm:$0xff] }
  0x8e   :  { %781 = vmatpush.msra.mxu0 %v308_v7  ;;  %801 = vmatpush.msra.mxu1 %v324_v8  ;;  %v369_v7 = vld [vmem:[%s2787_s3 + $0x260] sm:$0xff] }
  0x8f   :  { %821 = vmatpush.msra.mxu2 %v340_v9  ;;  %841 = vmatpush.msra.mxu3 %v356_v10  ;;  %v385_v8 = vld [vmem:[%s2787_s3 + $0x2e0] sm:$0xff]  ;;  %v326_v9 = vld [vmem:[%s2787_s3 + $0x108] sm:$0xff]  ;;  %v344_v10 = vld [vmem:[%s2787_s3 + $0x198] sm:$0xff] }
  0x90   :  { %782 = vmatpush.msra.mxu0 %v307_v11  ;;  %802 = vmatpush.msra.mxu1 %v323_v12  ;;  %v325_v11 = vld [vmem:[%s2787_s3 + $0x100] sm:$0xff]  ;;  %v343_v12 = vld [vmem:[%s2787_s3 + $0x190] sm:$0xff] }
  0x91   :  { %822 = vmatpush.msra.mxu2 %v339_v13  ;;  %842 = vmatpush.msra.mxu3 %v355_v49  ;;  %v368_v13 = vld [vmem:[%s2787_s3 + $0x258] sm:$0xff] }
  0x92   :  { %783 = vmatpush.msra.mxu0 %v306_v50  ;;  %803 = vmatpush.msra.mxu1 %v322_v14  ;;  %v384_v49 = vld [vmem:[%s2787_s3 + $0x2d8] sm:$0xff]  ;;  %v342_v50 = vld [vmem:[%s2787_s3 + $0x188] sm:$0xff]  ;;  %v367_v14 = vld [vmem:[%s2787_s3 + $0x250] sm:$0xff] }
  0x93   :  { %823 = vmatpush.msra.mxu2 %v338_v15  ;;  %843 = vmatpush.msra.mxu3 %v354_v16  ;;  %v383_v15 = vld [vmem:[%s2787_s3 + $0x2d0] sm:$0xff]  ;;  %v404_v16 = vld [vmem:[%s2787_s3 + $0x378] sm:$0xff] }
  0x94   :  { %784 = vmatpush.msra.mxu0 %v305_v17  ;;  %804 = vmatpush.msra.mxu1 %v321_v18  ;;  %v341_v17 = vld [vmem:[%s2787_s3 + $0x180] sm:$0xff]  ;;  %v366_v18 = vld [vmem:[%s2787_s3 + $0x248] sm:$0xff] }
  0x95   :  { %824 = vmatpush.msra.mxu2 %v337_v19  ;;  %844 = vmatpush.msra.mxu3 %v353_v20  ;;  %v382_v19 = vld [vmem:[%s2787_s3 + $0x2c8] sm:$0xff]  ;;  %v403_v20 = vld [vmem:[%s2787_s3 + $0x370] sm:$0xff] }
  0x96   :  { %785 = vmatpush.msra.mxu0 %v304_v21  ;;  %805 = vmatpush.msra.mxu1 %v320_v22  ;;  %v420_v21 = vld [vmem:[%s2787_s3 + $0x3f8] sm:$0xff]  ;;  %v402_v22 = vld [vmem:[%s2787_s3 + $0x368] sm:$0xff] }
  0x97   :  { %825 = vmatpush.msra.mxu2 %v336_v23  ;;  %845 = vmatpush.msra.mxu3 %v352_v24  ;;  %v365_v23 = vld [vmem:[%s2787_s3 + $0x240] sm:$0xff] }
  0x98   :  { %786 = vmatpush.msra.mxu0 %v303_v25  ;;  %806 = vmatpush.msra.mxu1 %v319_v26  ;;  %v381_v24 = vld [vmem:[%s2787_s3 + $0x2c0] sm:$0xff]  ;;  %v419_v25 = vld [vmem:[%s2787_s3 + $0x3f0] sm:$0xff] }
  0x99   :  { %826 = vmatpush.msra.mxu2 %v335_v27  ;;  %846 = vmatpush.msra.mxu3 %v351_v28  ;;  %v401_v26 = vld [vmem:[%s2787_s3 + $0x360] sm:$0xff]  ;;  %v2157_v27 = vld [vmem:[%s2787_s3 + $0x238] sm:$0xff] }
  0x9a   :  { %787 = vmatpush.msra.mxu0 %v302_v29  ;;  %807 = vmatpush.msra.mxu1 %v318_v30  ;;  %v380_v28 = vld [vmem:[%s2787_s3 + $0x2b8] sm:$0xff]  ;;  %v418_v29 = vld [vmem:[%s2787_s3 + $0x3e8] sm:$0xff] }
  0x9b   :  { %827 = vmatpush.msra.mxu2 %v334_v31  ;;  %847 = vmatpush.msra.mxu3 %v350_v46  ;;  %v400_v30 = vld [vmem:[%s2787_s3 + $0x358] sm:$0xff]  ;;  %v2171_v31 = vld [vmem:[%s2786_s2] sm:$0xff] }
  0x9c   :  { %788 = vmatpush.msra.mxu0 %v301_v32  ;;  %808 = vmatpush.msra.mxu1 %v317_v33  ;;  %v2176_v32 = vld [vmem:[%s2787_s3 + $0x230] sm:$0xff]  ;;  %v2215_v46 = vld [vmem:[%s2787_s3 + $0x2a0] sm:$0xff] }
  0x9d   :  { %828 = vmatpush.msra.mxu2 %v333_v34  ;;  %848 = vmatpush.msra.mxu3 %v349_v48  ;;  %v379_v33 = vld [vmem:[%s2787_s3 + $0x2b0] sm:$0xff]  ;;  %v749_v34 = vperm.slane %v2171_v31, 0 }
  0x9e   :  { %789 = vmatpush.msra.mxu0 %v300_v35  ;;  %809 = vmatpush.msra.mxu1 %v316_v36  ;;  %v417_v35 = vld [vmem:[%s2787_s3 + $0x3e0] sm:$0xff]  ;;  %v399_v36 = vld [vmem:[%s2787_s3 + $0x350] sm:$0xff] }
  0x9f   :  { %829 = vmatpush.msra.mxu2 %v332_v45  ;;  %849 = vmatpush.msra.mxu3 %v348_v54  ;;  %v2210_v45 = vld [vmem:[%s2787_s3 + $0x220] sm:$0xff] }
  0xa0   :  { %790 = vmatpush.msra.mxu0 %v299_v37  ;;  %810 = vmatpush.msra.mxu1 %v315_v38 }
  0xa1   :  { %830 = vmatpush.msra.mxu2 %v331_v47  ;;  %850 = vmatpush.msra.mxu3 %v347_v58  ;;  %v2242_v58 = vld [vmem:[%s2787_s3 + $0x3c8] sm:$0xff] }
  0xa2   :  { %791 = vmatpush.msra.mxu0 %v298_v39  ;;  %811 = vmatpush.msra.mxu1 %v314_v40  ;;  %v2192_v39 = vld [vmem:[%s2787_s3 + $0x228] sm:$0xff] }
  0xa3   :  { %831 = vmatpush.msra.mxu2 %v330_v53  ;;  %851 = vmatpush.msra.mxu3 %v346_v3  ;;  %v2197_v40 = vld [vmem:[%s2787_s3 + $0x2a8] sm:$0xff]  ;;  %v397_v53 = vld [vmem:[%s2787_s3 + $0x340] sm:$0xff]  ;;  %v2280_v3 = vld [vmem:[%s2787_s3 + $0x338] sm:$0xff] }
  0xa4   :  { %792 = vmatpush.msra.mxu0 %v297_v41  ;;  %812 = vmatpush.msra.mxu1 %v313_v42  ;;  %v416_v42 = vld [vmem:[%s2787_s3 + $0x3d8] sm:$0xff] }
  0xa5   :  { %832 = vmatpush.msra.mxu2 %v329_v57  ;;  %852 = vmatpush.msra.mxu3 %v345_v6 }
  0xa6   :  { %793 = vmatpush.msra.mxu0 %v296_v43  ;;  %813 = vmatpush.msra.mxu1 %v312_v44  ;;  %v398_v43 = vld [vmem:[%s2787_s3 + $0x348] sm:$0xff]  ;;  %v750_v44 = vperm.slane %v2171_v31, 1 }
  0xa7   :  { %833 = vmatpush.msra.mxu2 %v328_v2  ;;  %853 = vmatpush.msra.mxu3 %v344_v10  ;;  %v751_v2 = vperm.slane %v2171_v31, 2  ;;  %v752_v10 = vperm.slane %v2171_v31, 3 }
  0xa8   :  { %794 = vmatpush.msra.mxu0 %v295_v51  ;;  %814 = vmatpush.msra.mxu1 %v311_v52  ;;  %v415_v52 = vld [vmem:[%s2787_s3 + $0x3d0] sm:$0xff] }
  0xa9   :  { %834 = vmatpush.msra.mxu2 %v327_v5  ;;  %854 = vmatpush.msra.mxu3 %v343_v12  ;;  %v2311_v12 = vld [vmem:[%s2787_s3 + $0x3b0] sm:$0xff] }
  0xaa   :  { %795 = vmatpush.msra.mxu0 %v294_v55  ;;  %815 = vmatpush.msra.mxu1 %v310_v56  ;;  %v2230_v55 = vld [vmem:[%s2787_s3 + $0x218] sm:$0xff] }
  0xab   :  { %835 = vmatpush.msra.mxu2 %v326_v9  ;;  %855 = vmatpush.msra.mxu3 %v342_v50  ;;  %v2235_v56 = vld [vmem:[%s2787_s3 + $0x298] sm:$0xff] }
  0xac   :  { %796 = vmatpush.msra.mxu0 %v293_v59  ;;  %816 = vmatpush.msra.mxu1 %v309_v60  ;;  %v2249_v60 = vld [vmem:[%s2787_s3 + $0x210] sm:$0xff] }
  0xad   :  { %836 = vmatpush.msra.mxu2 %v325_v11  ;;  %856 = vmatpush.msra.mxu3 %v341_v17  ;;  %v2306_v11 = vld [vmem:[%s2787_s3 + $0x330] sm:$0xff]  ;;  %v2320_v17 = vld [vmem:[%s2787_s3 + $0x3a8] sm:$0xff] }
  0xae   :  { %861 = vmatpush.msrb.mxu0 %v372_v61  ;;  %881 = vmatpush.msrb.mxu1 %v388_v62  ;;  %v2254_v61 = vld [vmem:[%s2787_s3 + $0x290] sm:$0xff]  ;;  %v2261_v62 = vld [vmem:[%s2787_s3 + $0x3c0] sm:$0xff] }
  0xaf   :  { %901 = vmatpush.msrb.mxu2 %v404_v16  ;;  %921 = vmatpush.msrb.mxu3 %v420_v21  ;;  %v1459_v16 = vld [vmem:[#allocation2 + $0x7c0] sm:$0xff] }
  0xb0   :  { %862 = vmatpush.msrb.mxu0 %v371_v63  ;;  %882 = vmatpush.msrb.mxu1 %v387_v0  ;;  %v2266_v0 = vld [vmem:[%s2787_s3 + $0x208] sm:$0xff]  ;;  %v1461_v21 = vld [vmem:[#allocation2 + $0x780] sm:$0xff] }
  0xb1   :  { %902 = vmatpush.msrb.mxu2 %v403_v20  ;;  %922 = vmatpush.msrb.mxu3 %v419_v25  ;;  %v1460_v20 = vld [vmem:[#allocation2 + $0x380] sm:$0xff] }
  0xb2   :  { %863 = vmatpush.msrb.mxu0 %v370_v1  ;;  %883 = vmatpush.msrb.mxu1 %v386_v4  ;;  %v2271_v1 = vld [vmem:[%s2787_s3 + $0x288] sm:$0xff]  ;;  %v2285_v4 = vld [vmem:[%s2787_s3 + $0x3b8] sm:$0xff]  ;;  %v1462_v25 = vld [vmem:[#allocation2 + $0x340] sm:$0xff] }
  0xb3   :  { %903 = vmatpush.msrb.mxu2 %v402_v22  ;;  %923 = vmatpush.msrb.mxu3 %v418_v29  ;;  %v2329_v22 = vld [vmem:[%s2787_s3 + $0x328] sm:$0xff]  ;;  %v2347_v29 = vld [vmem:[%s2787_s3 + $0x398] sm:$0xff] }
  0xb4   :  { %864 = vmatpush.msrb.mxu0 %v369_v7  ;;  %884 = vmatpush.msrb.mxu1 %v385_v8  ;;  %v2290_v7 = vld [vmem:[%s2787_s3 + $0x200] sm:$0xff] }
  0xb5   :  { %904 = vmatpush.msrb.mxu2 %v401_v26  ;;  %924 = vmatpush.msrb.mxu3 %v417_v35  ;;  %v2295_v8 = vld [vmem:[%s2787_s3 + $0x280] sm:$0xff] }
  0xb6   :  { %865 = vmatpush.msrb.mxu0 %v368_v13  ;;  %885 = vmatpush.msrb.mxu1 %v384_v49  ;;  %v1463_v26 = vld [vmem:[#allocation2 + $0x740] sm:$0xff] }
  0xb7   :  { %905 = vmatpush.msrb.mxu2 %v400_v30  ;;  %925 = vmatpush.msrb.mxu3 %v416_v42  ;;  %v1464_v30 = vld [vmem:[#allocation2 + $0x300] sm:$0xff]  ;;  %v2370_v42 = vld [vmem:[%s2787_s3 + $0x388] sm:$0xff] }
  0xb8   :  { %866 = vmatpush.msrb.mxu0 %v367_v14  ;;  %886 = vmatpush.msrb.mxu1 %v383_v15  ;;  %v1458_v15 = vld [vmem:[#allocation2 + $0x3c0] sm:$0xff] }
  0xb9   :  { %906 = vmatpush.msrb.mxu2 %v399_v36  ;;  %926 = vmatpush.msrb.mxu3 %v415_v52  ;;  %v1465_v35 = vld [vmem:[#allocation2 + $0x700] sm:$0xff]  ;;  %v2358_v36 = vld [vmem:[%s2787_s3 + $0x390] sm:$0xff] }
  0xba   :  { %867 = vmatpush.msrb.mxu0 %v366_v18  ;;  %887 = vmatpush.msrb.mxu1 %v382_v19  ;;  %v1470_v52 = vld [vmem:[#allocation2 + $0x240] sm:$0xff] }
  0xbb   :  { %907 = vmatpush.msrb.mxu2 %v398_v43  ;;  %927 = vmatpush.msrb.mxu3 %v2242_v58  ;;  %v1468_v43 = vld [vmem:[#allocation2 + $0x280] sm:$0xff] }
  0xbc   :  { %868 = vmatpush.msrb.mxu0 %v365_v23  ;;  %888 = vmatpush.msrb.mxu1 %v381_v24  ;;  %v2334_v23 = vld [vmem:[%s2787_s3 + $0x3a0] sm:$0xff] }
  0xbd   :  { %908 = vmatpush.msrb.mxu2 %v397_v53  ;;  %928 = vmatpush.msrb.mxu3 %v2261_v62  ;;  %v2388_v53 = vld [vmem:[%s2787_s3 + $0x300] sm:$0xff] }
  0xbe   :  { %869 = vmatpush.msrb.mxu0 %v2157_v27  ;;  %889 = vmatpush.msrb.mxu1 %v380_v28  ;;  %v445_v37 = vpop.f32.mrf.mxu0  ;;  %v465_v38 = vpop.f32.mrf.mxu1  ;;  %v2340_v28 = vld [vmem:[%s2787_s3 + $0x320] sm:$0xff] }
  0xbf   :  { %v466_v41 = vadd.f32 %v465_v38, %v445_v37  ;;  %909 = vmatpush.msrb.mxu2 %v2280_v3  ;;  %929 = vmatpush.msrb.mxu3 %v2285_v4  ;;  %v1466_v37 = vld [vmem:[#allocation2 + $0x2c0] sm:$0xff]  ;;  %v2364_v38 = vld [vmem:[%s2787_s3 + $0x310] sm:$0xff] }
  0xc0   :  { %870 = vmatpush.msrb.mxu0 %v2176_v32  ;;  %890 = vmatpush.msrb.mxu1 %v379_v33  ;;  %v2352_v33 = vld [vmem:[%s2787_s3 + $0x318] sm:$0xff] }
  0xc1   :  { %v765_v47 = vsub.f32 %v466_v41, %v749_v34  ;;  %v485_v48 = vpop.f32.mrf.mxu2  ;;  %v505_v51 = vpop.f32.mrf.mxu3  ;;  %910 = vmatpush.msrb.mxu2 %v2306_v11  ;;  %930 = vmatpush.msrb.mxu3 %v2311_v12  ;;  %v1467_v41 = vld [vmem:[#allocation2 + $0x6c0] sm:$0xff] }
  0xc2   :  { %871 = vmatpush.msrb.mxu0 %v2192_v39  ;;  %891 = vmatpush.msrb.mxu1 %v2197_v40  ;;  %v506_v54 = vadd.f32 %v505_v51, %v485_v48  ;;  %v1469_v48 = vld [vmem:[#allocation2 + $0x680] sm:$0xff] }
  0xc3   :  { %v773_v57 = vmul.f32 %v765_v47, %v765_v47  ;;  %931 = vmatpush.msrb.mxu3 %v2320_v17  ;;  %911 = vmatpush.msrb.mxu2 %v2329_v22  ;;  %v2376_v47 = vld [vmem:[%s2787_s3 + $0x308] sm:$0xff]  ;;  %v2382_v51 = vld [vmem:[%s2787_s3 + $0x380] sm:$0xff] }
  0xc4   :  { %872 = vmatpush.msrb.mxu0 %v2210_v45  ;;  %892 = vmatpush.msrb.mxu1 %v2215_v46  ;;  %v766_v59 = vsub.f32 %v506_v54, %v750_v44  ;;  %v1471_v54 = vld [vmem:[#allocation2 + $0x640] sm:$0xff] }
  0xc5   :  { %797 = vmatmul.f32.vlgmr.msra.gmra.mxu0 %v773_v57  ;;  %932 = vmatpush.msrb.mxu3 %v2334_v23  ;;  %v1472_v57 = vld [vmem:[#allocation2 + $0x200] sm:$0xff] }
  0xc6   :  { %873 = vmatpush.msrb.mxu0 %v2230_v55  ;;  %893 = vmatpush.msrb.mxu1 %v2235_v56  ;;  %v774_v63 = vmul.f32 %v766_v59, %v766_v59  ;;  %v1473_v59 = vld [vmem:[#allocation2 + $0x600] sm:$0xff] }
  0xc7   :  { %912 = vmatpush.msrb.mxu2 %v2340_v28  ;;  %933 = vmatpush.msrb.mxu3 %v2347_v29 }
  0xc8   :  { %874 = vmatpush.msrb.mxu0 %v2249_v60  ;;  %894 = vmatpush.msrb.mxu1 %v2254_v61  ;;  %v525_v5 = vpop.f32.mrf.mxu0  ;;  %v545_v6 = vpop.f32.mrf.mxu1 }
  0xc9   :  { %817 = vmatmul.f32.vlgmr.msra.gmra.mxu1 %v774_v63  ;;  %v546_v9 = vadd.f32 %v545_v6, %v525_v5  ;;  %913 = vmatpush.msrb.mxu2 %v2352_v33  ;;  %v1474_v63 = vld [vmem:[#allocation2 + $0x1c0] sm:$0xff]  ;;  %v1475_v5 = vld [vmem:[#allocation2 + $0x3c8] sm:$0xff] }
  0xca   :  { %875 = vmatpush.msrb.mxu0 %v2266_v0  ;;  %895 = vmatpush.msrb.mxu1 %v2271_v1  ;;  %v1476_v6 = vld [vmem:[#allocation2 + $0x5c0] sm:$0xff] }
  0xcb   :  { %v767_v13 = vsub.f32 %v546_v9, %v751_v2  ;;  %v565_v49 = vpop.f32.mrf.mxu2  ;;  %v585_v50 = vpop.f32.mrf.mxu3  ;;  %934 = vmatpush.msrb.mxu3 %v2358_v36  ;;  %914 = vmatpush.msrb.mxu2 %v2364_v38  ;;  %v1477_v9 = vld [vmem:[#allocation2 + $0x7c8] sm:$0xff] }
  0xcc   :  { %876 = vmatpush.msrb.mxu0 %v2290_v7  ;;  %896 = vmatpush.msrb.mxu1 %v2295_v8  ;;  %v586_v14 = vadd.f32 %v585_v50, %v565_v49  ;;  %v1479_v49 = vld [vmem:[#allocation2 + $0x388] sm:$0xff]  ;;  %v1480_v50 = vld [vmem:[#allocation2 + $0x580] sm:$0xff] }
  0xcd   :  { %v775_v18 = vmul.f32 %v767_v13, %v767_v13  ;;  %935 = vmatpush.msrb.mxu3 %v2370_v42  ;;  %915 = vmatpush.msrb.mxu2 %v2376_v47  ;;  %v1478_v13 = vld [vmem:[#allocation2 + $0x180] sm:$0xff] }
  0xce   :  { %947 = vmatpush.msra.mxu0 %v1458_v15  ;;  %967 = vmatpush.msra.mxu1 %v1459_v16  ;;  %v768_v19 = vsub.f32 %v586_v14, %v752_v10  ;;  %v1481_v14 = vld [vmem:[#allocation2 + $0x788] sm:$0xff]  ;;  %v1482_v15 = vld [vmem:[#allocation2 + $0x140] sm:$0xff] }
  0xcf   :  { %837 = vmatmul.f32.vlgmr.msra.gmra.mxu2 %v775_v18  ;;  %936 = vmatpush.msrb.mxu3 %v2382_v51  ;;  %v1483_v16 = vld [vmem:[#allocation2 + $0x348] sm:$0xff]  ;;  %v1484_v18 = vld [vmem:[#allocation2 + $0x540] sm:$0xff] }
  0xd0   :  { %948 = vmatpush.msra.mxu0 %v1460_v20  ;;  %968 = vmatpush.msra.mxu1 %v1461_v21  ;;  %v776_v24 = vmul.f32 %v768_v19, %v768_v19  ;;  %v1485_v19 = vld [vmem:[#allocation2 + $0x748] sm:$0xff]  ;;  %v1486_v20 = vld [vmem:[#allocation2 + $0x100] sm:$0xff] }
  0xd1   :  { %916 = vmatpush.msrb.mxu2 %v2388_v53  ;;  %v1487_v21 = vld [vmem:[#allocation2 + $0x308] sm:$0xff] }
  0xd2   :  { %949 = vmatpush.msra.mxu0 %v1462_v25  ;;  %969 = vmatpush.msra.mxu1 %v1463_v26  ;;  %v1489_v25 = vld [vmem:[#allocation2 + $0x708] sm:$0xff]  ;;  %v1490_v26 = vld [vmem:[#allocation2 + $0xc0] sm:$0xff] }
  0xd3   :  { %857 = vmatmul.f32.vlgmr.msra.gmra.mxu3 %v776_v24  ;;  %987 = vmatpush.msra.mxu2 %v1475_v5  ;;  %v1488_v24 = vld [vmem:[#allocation2 + $0x500] sm:$0xff] }
  0xd4   :  { %950 = vmatpush.msra.mxu0 %v1464_v30  ;;  %970 = vmatpush.msra.mxu1 %v1465_v35  ;;  %v1491_v30 = vld [vmem:[#allocation2 + $0x2c8] sm:$0xff]  ;;  %v1492_v35 = vld [vmem:[#allocation2 + $0x4c0] sm:$0xff] }
  0xd5   :  { %1007 = vmatpush.msra.mxu3 %v1477_v9  ;;  %988 = vmatpush.msra.mxu2 %v1479_v49  ;;  %v1498_v5 = vld [vmem:[#allocation2 + $0x40] sm:$0xff] }
  0xd6   :  { %951 = vmatpush.msra.mxu0 %v1466_v37  ;;  %971 = vmatpush.msra.mxu1 %v1467_v41  ;;  %v1493_v37 = vld [vmem:[#allocation2 + $0x6c8] sm:$0xff]  ;;  %v753_v41 = vperm.slane %v2171_v31, 4  ;;  %v1500_v9 = vld [vmem:[#allocation2 + $0x440] sm:$0xff] }
  0xd7   :  { %1008 = vmatpush.msra.mxu3 %v1481_v14  ;;  %989 = vmatpush.msra.mxu2 %v1483_v16  ;;  %v1503_v14 = vld [vmem:[#allocation2 + $0x208] sm:$0xff] }
  0xd8   :  { %952 = vmatpush.msra.mxu0 %v1468_v43  ;;  %972 = vmatpush.msra.mxu1 %v1469_v48  ;;  %v1494_v43 = vld [vmem:[#allocation2 + $0x80] sm:$0xff]  ;;  %v1495_v48 = vld [vmem:[#allocation2 + $0x288] sm:$0xff] }
  0xd9   :  { %1009 = vmatpush.msra.mxu3 %v1485_v19  ;;  %990 = vmatpush.msra.mxu2 %v1487_v21  ;;  %v1505_v16 = vld [vmem:[#allocation2 + $0x608] sm:$0xff] }
  0xda   :  { %953 = vmatpush.msra.mxu0 %v1470_v52  ;;  %973 = vmatpush.msra.mxu1 %v1471_v54  ;;  %v1506_v19 = vld [vmem:[#allocation2 + $0x1c8] sm:$0xff] }
  0xdb   :  { %1010 = vmatpush.msra.mxu3 %v1489_v25  ;;  %991 = vmatpush.msra.mxu2 %v1491_v30  ;;  %v1507_v21 = vld [vmem:[#allocation2 + $0x5c8] sm:$0xff] }
  0xdc   :  { %954 = vmatpush.msra.mxu0 %v1472_v57  ;;  %974 = vmatpush.msra.mxu1 %v1473_v59  ;;  %v1496_v57 = vld [vmem:[#allocation2 + $0x480] sm:$0xff]  ;;  %v1497_v59 = vld [vmem:[#allocation2 + $0x688] sm:$0xff] }
  0xdd   :  { %1011 = vmatpush.msra.mxu3 %v1493_v37  ;;  %992 = vmatpush.msra.mxu2 %v1495_v48  ;;  %v1510_v37 = vld [vmem:[#allocation2 + $0x588] sm:$0xff] }
  0xde   :  { %955 = vmatpush.msra.mxu0 %v1474_v63  ;;  %975 = vmatpush.msra.mxu1 %v1476_v6  ;;  %v1499_v6 = vld [vmem:[#allocation2 + $0x248] sm:$0xff] }
  0xdf   :  { %1012 = vmatpush.msra.mxu3 %v1497_v59  ;;  %993 = vmatpush.msra.mxu2 %v1499_v6  ;;  %v1517_v6 = vld [vmem:[#allocation2 + $0xc8] sm:$0xff] }
  0xe0   :  { %956 = vmatpush.msra.mxu0 %v1478_v13  ;;  %976 = vmatpush.msra.mxu1 %v1480_v50  ;;  %v1501_v13 = vld [vmem:[#allocation2 + $0x648] sm:$0xff]  ;;  %v1502_v50 = vld [vmem:[#allocation2] sm:$0xff] }
  0xe1   :  { %1013 = vmatpush.msra.mxu3 %v1501_v13  ;;  %994 = vmatpush.msra.mxu2 %v1503_v14  ;;  %v1519_v13 = vld [vmem:[#allocation2 + $0x7d0] sm:$0xff]  ;;  %v1522_v14 = vld [vmem:[#allocation2 + $0x88] sm:$0xff] }
  0xe2   :  { %957 = vmatpush.msra.mxu0 %v1482_v15  ;;  %977 = vmatpush.msra.mxu1 %v1484_v18  ;;  %v1504_v15 = vld [vmem:[#allocation2 + $0x400] sm:$0xff] }
  0xe3   :  { %1014 = vmatpush.msra.mxu3 %v1505_v16  ;;  %995 = vmatpush.msra.mxu2 %v1506_v19  ;;  %v1523_v16 = vld [vmem:[#allocation2 + $0x790] sm:$0xff] }
  0xe4   :  { %958 = vmatpush.msra.mxu0 %v1486_v20  ;;  %978 = vmatpush.msra.mxu1 %v1488_v24  ;;  %v754_v20 = vperm.slane %v2171_v31, 5  ;;  %v1525_v19 = vld [vmem:[#allocation2 + $0x290] sm:$0xff] }
  0xe5   :  { %1015 = vmatpush.msra.mxu3 %v1507_v21  ;;  %v1526_v21 = vld [vmem:[#allocation2 + $0x48] sm:$0xff] }
  0xe6   :  { %959 = vmatpush.msra.mxu0 %v1490_v26  ;;  %979 = vmatpush.msra.mxu1 %v1492_v35  ;;  %v1508_v26 = vld [vmem:[#allocation2 + $0x188] sm:$0xff]  ;;  %v1509_v35 = vld [vmem:[#allocation2 + $0x3d0] sm:$0xff] }
  0xe7   :  { %v605_v52 = vpop.f32.mrf.mxu0  ;;  %v625_v54 = vpop.f32.mrf.mxu1  ;;  %996 = vmatpush.msra.mxu2 %v1508_v26  ;;  %1016 = vmatpush.msra.mxu3 %v1510_v37  ;;  %v1528_v26 = vld [vmem:[#allocation2 + $0x448] sm:$0xff] }
  0xe8   :  { %960 = vmatpush.msra.mxu0 %v1494_v43  ;;  %980 = vmatpush.msra.mxu1 %v1496_v57  ;;  %v626_v63 = vadd.f32 %v625_v54, %v605_v52  ;;  %v1511_v43 = vld [vmem:[#allocation2 + $0x148] sm:$0xff]  ;;  %v1512_v52 = vld [vmem:[#allocation2 + $0x390] sm:$0xff] }
  0xe9   :  { %997 = vmatpush.msra.mxu2 %v1511_v43  ;;  %v1513_v54 = vld [vmem:[#allocation2 + $0x548] sm:$0xff]  ;;  %v1531_v43 = vld [vmem:[#allocation2 + $0x710] sm:$0xff] }
  0xea   :  { %961 = vmatpush.msra.mxu0 %v1498_v5  ;;  %981 = vmatpush.msra.mxu1 %v1500_v9  ;;  %v769_v49 = vsub.f32 %v626_v63, %v753_v41  ;;  %v1514_v57 = vld [vmem:[#allocation2 + $0x108] sm:$0xff]  ;;  %v1515_v63 = vld [vmem:[#allocation2 + $0x350] sm:$0xff] }
  0xeb   :  { %1017 = vmatpush.msra.mxu3 %v1513_v54  ;;  %998 = vmatpush.msra.mxu2 %v1514_v57  ;;  %v1516_v5 = vld [vmem:[#allocation2 + $0x508] sm:$0xff]  ;;  %v1518_v9 = vld [vmem:[#allocation2 + $0x310] sm:$0xff] }
  0xec   :  { %962 = vmatpush.msra.mxu0 %v1502_v50  ;;  %982 = vmatpush.msra.mxu1 %v1504_v15  ;;  %v777_v18 = vmul.f32 %v769_v49, %v769_v49  ;;  %v1520_v49 = vld [vmem:[#allocation2 + $0x4c8] sm:$0xff]  ;;  %v1521_v50 = vld [vmem:[#allocation2 + $0x2d0] sm:$0xff]  ;;  %v941_v15 = vld [vmem:[%s2784_s0 + $0x2] sm:$0x3] }
  0xed   :  { %1018 = vmatpush.msra.mxu3 %v1516_v5  ;;  %999 = vmatpush.msra.mxu2 %v1517_v6  ;;  %v1530_v37 = vld [vmem:[#allocation2 + $0x8] sm:$0xff]  ;;  %v1534_v54 = vld [vmem:[#allocation2 + $0x6d0] sm:$0xff] }
  0xee   :  { %v645_v24 = vpop.f32.mrf.mxu2  ;;  %v665_v25 = vpop.f32.mrf.mxu3  ;;  %877 = vmatmul.f32.vlgmr.msrb.gmra.mxu0 %v777_v18  ;;  %v1524_v18 = vld [vmem:[#allocation2 + $0x488] sm:$0xff]  ;;  %v1535_v57 = vld [vmem:[#allocation2 + $0x1d0] sm:$0xff] }
  0xef   :  { %v666_v30 = vadd.f32 %v665_v25, %v645_v24  ;;  %1027 = vmatpush.msrb.mxu0 %v1509_v35  ;;  %1019 = vmatpush.msra.mxu3 %v1520_v49  ;;  %v2402_v24 = vperm.slane %v941_v15, 1  ;;  %v1527_v25 = vld [vmem:[#allocation2 + $0x750] sm:$0xff] }
  0xf0   :  { %1000 = vmatpush.msra.mxu2 %v1522_v14  ;;  %v1529_v35 = vld [vmem:[#allocation2 + $0x250] sm:$0xff]  ;;  %v755_v14 = vperm.slane %v2171_v31, 6 }
  0xf1   :  { %v770_v48 = vsub.f32 %v666_v30, %v754_v20  ;;  %1028 = vmatpush.msrb.mxu0 %v1512_v52  ;;  %1020 = vmatpush.msra.mxu3 %v1524_v18  ;;  %v2404_v30 = vperm.slane %v941_v15, 0  ;;  %v1533_v52 = vld [vmem:[#allocation2 + $0x210] sm:$0xff] }
  0xf2   :  { %1001 = vmatpush.msra.mxu2 %v1526_v21  ;;  %v1538_v5 = vld [vmem:[#allocation2 + $0x650] sm:$0xff] }
  0xf3   :  { %v778_v59 = vmul.f32 %v770_v48, %v770_v48  ;;  %1029 = vmatpush.msrb.mxu0 %v1515_v63  ;;  %1021 = vmatpush.msra.mxu3 %v1528_v26  ;;  %v1532_v48 = vld [vmem:[#allocation2 + $0x408] sm:$0xff]  ;;  %v1537_v63 = vld [vmem:[#allocation2 + $0x190] sm:$0xff] }
  0xf4   :  { %1002 = vmatpush.msra.mxu2 %v1530_v37  ;;  %v1539_v6 = vld [vmem:[#allocation2 + $0x150] sm:$0xff] }
  0xf5   :  { %897 = vmatmul.f32.vlgmr.msrb.gmra.mxu1 %v778_v59  ;;  %1030 = vmatpush.msrb.mxu0 %v1518_v9  ;;  %v1536_v59 = vld [vmem:[#allocation2 + $0x690] sm:$0xff] }
  0xf6   :  { %1047 = vmatpush.msrb.mxu1 %v1519_v13  ;;  %1022 = vmatpush.msra.mxu3 %v1532_v48  ;;  %v1540_v9 = vld [vmem:[#allocation2 + $0x610] sm:$0xff] }
  0xf7   :  { %1031 = vmatpush.msrb.mxu0 %v1521_v50  ;;  %v1541_v13 = vld [vmem:[#allocation2 + $0x110] sm:$0xff] }
  0xf8   :  { %1048 = vmatpush.msrb.mxu1 %v1523_v16  ;;  %963 = vmatmul.f32.vlgmr.msra.gmra.mxu0 %v2404_v30  ;;  %v1542_v49 = vld [vmem:[#allocation2 + $0x5d0] sm:$0xff] }
  0xf9   :  { %1032 = vmatpush.msrb.mxu0 %v1525_v19  ;;  %v1543_v50 = vld [vmem:[#allocation2 + $0xd0] sm:$0xff] }
  0xfa   :  { %1049 = vmatpush.msrb.mxu1 %v1527_v25  ;;  %v1544_v15 = vld [vmem:[#allocation2 + $0x590] sm:$0xff] }
  0xfb   :  { %1033 = vmatpush.msrb.mxu0 %v1529_v35  ;;  %v1545_v19 = vld [vmem:[#allocation2 + $0x90] sm:$0xff] }
  0xfc   :  { %1050 = vmatpush.msrb.mxu1 %v1531_v43  ;;  %v1546_v25 = vld [vmem:[#allocation2 + $0x550] sm:$0xff] }
  0xfd   :  { %1034 = vmatpush.msrb.mxu0 %v1533_v52  ;;  %983 = vmatmul.f32.vlgmr.msra.gmra.mxu1 %v2402_v24  ;;  %v1547_v26 = vld [vmem:[#allocation2 + $0x50] sm:$0xff] }
  0xfe   :  { %1051 = vmatpush.msrb.mxu1 %v1534_v54  ;;  %v1548_v37 = vld [vmem:[#allocation2 + $0x510] sm:$0xff]  ;;  %v1551_v54 = vld [vmem:[#allocation2 + $0x3e0] sm:$0xff] }
  0xff   :  { %1035 = vmatpush.msrb.mxu0 %v1535_v57  ;;  %v1549_v43 = vld [vmem:[#allocation2 + $0x10] sm:$0xff]  ;;  %v756_v57 = vperm.slane %v2171_v31, 7 }
 0x100   :  { %1052 = vmatpush.msrb.mxu1 %v1536_v59  ;;  %v1550_v52 = vld [vmem:[#allocation2 + $0x4d0] sm:$0xff] }
 0x101   :  { %1036 = vmatpush.msrb.mxu0 %v1537_v63 }
 0x102   :  { %1053 = vmatpush.msrb.mxu1 %v1538_v5  ;;  %v1552_v5 = vld [vmem:[#allocation2 + $0x490] sm:$0xff] }
 0x103   :  { %1037 = vmatpush.msrb.mxu0 %v1539_v6 }
 0x104   :  { %1054 = vmatpush.msrb.mxu1 %v1540_v9  ;;  %v1553_v9 = vld [vmem:[#allocation2 + $0x3d8] sm:$0xff] }
 0x105   :  { %1038 = vmatpush.msrb.mxu0 %v1541_v13  ;;  %v1554_v13 = vld [vmem:[#allocation2 + $0x3a0] sm:$0xff] }
 0x106   :  { %1055 = vmatpush.msrb.mxu1 %v1542_v49  ;;  %v1555_v49 = vld [vmem:[#allocation2 + $0x450] sm:$0xff] }
 0x107   :  { %1039 = vmatpush.msrb.mxu0 %v1543_v50 }
 0x108   :  { %1056 = vmatpush.msrb.mxu1 %v1544_v15  ;;  %v1556_v15 = vld [vmem:[#allocation2 + $0x398] sm:$0xff] }
 0x109   :  { %v685_v16 = vpop.f32.mrf.mxu0  ;;  %v705_v18 = vpop.f32.mrf.mxu1  ;;  %1040 = vmatpush.msrb.mxu0 %v1545_v19 }
 0x10a   :  { %v706_v21 = vadd.f32 %v705_v18, %v685_v16  ;;  %1057 = vmatpush.msrb.mxu1 %v1546_v25  ;;  %v1557_v16 = vld [vmem:[#allocation2 + $0x360] sm:$0xff]  ;;  %v1558_v18 = vld [vmem:[#allocation2 + $0x410] sm:$0xff]  ;;  %v1560_v25 = vld [vmem:[#allocation2 + $0x358] sm:$0xff] }
 0x10b   :  { %1041 = vmatpush.msrb.mxu0 %v1547_v26  ;;  %v1561_v26 = vld [vmem:[#allocation2 + $0x320] sm:$0xff] }
 0x10c   :  { %v771_v35 = vsub.f32 %v706_v21, %v755_v14  ;;  %1058 = vmatpush.msrb.mxu1 %v1548_v37  ;;  %v1559_v21 = vld [vmem:[#allocation2 + $0x7e0] sm:$0xff]  ;;  %v1563_v37 = vld [vmem:[#allocation2 + $0x7d8] sm:$0xff] }
 0x10d   :  { %1042 = vmatpush.msrb.mxu0 %v1549_v43  ;;  %v1564_v43 = vld [vmem:[#allocation2 + $0x318] sm:$0xff] }
 0x10e   :  { %v779_v48 = vmul.f32 %v771_v35, %v771_v35  ;;  %1059 = vmatpush.msrb.mxu1 %v1550_v52  ;;  %1043 = vmatmul.f32.vlgmr.msrb.gmra.mxu0 %v2404_v30  ;;  %v1562_v35 = vld [vmem:[#allocation2 + $0x7a0] sm:$0xff] }
 0x10f   :  { %1107 = vmatpush.msra.mxu0 %v1551_v54  ;;  %v1566_v52 = vld [vmem:[#allocation2 + $0x2e0] sm:$0xff]  ;;  %v1567_v54 = vld [vmem:[#allocation2 + $0x798] sm:$0xff] }
 0x110   :  { %v725_v59 = vpop.f32.mrf.mxu2  ;;  %v745_v63 = vpop.f32.mrf.mxu3  ;;  %917 = vmatmul.f32.vlgmr.msrb.gmra.mxu2 %v779_v48  ;;  %1060 = vmatpush.msrb.mxu1 %v1552_v5  ;;  %v1565_v48 = vld [vmem:[#allocation2 + $0x760] sm:$0xff] }
 0x111   :  { %v746_v6 = vadd.f32 %v745_v63, %v725_v59  ;;  %1067 = vmatpush.msrb.mxu2 %v1553_v9  ;;  %1108 = vmatpush.msra.mxu0 %v1554_v13  ;;  %v1568_v59 = vld [vmem:[#allocation2 + $0x2d8] sm:$0xff]  ;;  %v1569_v63 = vld [vmem:[#allocation2 + $0x720] sm:$0xff] }
 0x112   :  { %1061 = vmatpush.msrb.mxu1 %v1555_v49  ;;  %v1570_v5 = vld [vmem:[#allocation2 + $0x2a0] sm:$0xff]  ;;  %v1572_v9 = vld [vmem:[#allocation2 + $0x298] sm:$0xff] }
 0x113   :  { %v772_v50 = vsub.f32 %v746_v6, %v756_v57  ;;  %1068 = vmatpush.msrb.mxu2 %v1556_v15  ;;  %1109 = vmatpush.msra.mxu0 %v1557_v16  ;;  %v1571_v6 = vld [vmem:[#allocation2 + $0x758] sm:$0xff]  ;;  %v1573_v13 = vld [vmem:[#allocation2 + $0x6e0] sm:$0xff] }
 0x114   :  { %1062 = vmatpush.msrb.mxu1 %v1558_v18  ;;  %v1574_v49 = vld [vmem:[#allocation2 + $0x260] sm:$0xff]  ;;  %v1576_v15 = vld [vmem:[#allocation2 + $0x258] sm:$0xff] }
 0x115   :  { %v780_v19 = vmul.f32 %v772_v50, %v772_v50  ;;  %1069 = vmatpush.msrb.mxu2 %v1560_v25  ;;  %1110 = vmatpush.msra.mxu0 %v1561_v26  ;;  %v1575_v50 = vld [vmem:[#allocation2 + $0x718] sm:$0xff]  ;;  %v1577_v16 = vld [vmem:[#allocation2 + $0x6a0] sm:$0xff] }
 0x116   :  { %1127 = vmatpush.msra.mxu1 %v1559_v21  ;;  %v1578_v18 = vld [vmem:[#allocation2 + $0x220] sm:$0xff]  ;;  %v1580_v21 = vld [vmem:[#allocation2 + $0x218] sm:$0xff] }
 0x117   :  { %1063 = vmatmul.f32.vlgmr.msrb.gmra.mxu1 %v2402_v24  ;;  %937 = vmatmul.f32.vlgmr.msrb.gmra.mxu3 %v780_v19  ;;  %v1579_v19 = vld [vmem:[#allocation2 + $0x6d8] sm:$0xff]  ;;  %v1581_v25 = vld [vmem:[#allocation2 + $0x660] sm:$0xff] }
 0x118   :  { %1128 = vmatpush.msra.mxu1 %v1562_v35  ;;  %1087 = vmatpush.msrb.mxu3 %v1563_v37  ;;  %v1582_v26 = vld [vmem:[#allocation2 + $0x1e0] sm:$0xff]  ;;  %v1583_v35 = vld [vmem:[#allocation2 + $0x698] sm:$0xff] }
 0x119   :  { %1070 = vmatpush.msrb.mxu2 %v1564_v43  ;;  %1111 = vmatpush.msra.mxu0 %v1566_v52  ;;  %v1584_v37 = vld [vmem:[#allocation2 + $0x1d8] sm:$0xff]  ;;  %v1585_v43 = vld [vmem:[#allocation2 + $0x620] sm:$0xff] }
 0x11a   :  { %1129 = vmatpush.msra.mxu1 %v1565_v48  ;;  %1088 = vmatpush.msrb.mxu3 %v1567_v54  ;;  %v1586_v48 = vld [vmem:[#allocation2 + $0x1a0] sm:$0xff]  ;;  %v1587_v52 = vld [vmem:[#allocation2 + $0x658] sm:$0xff] }
 0x11b   :  { %1071 = vmatpush.msrb.mxu2 %v1568_v59  ;;  %1112 = vmatpush.msra.mxu0 %v1570_v5  ;;  %v1588_v54 = vld [vmem:[#allocation2 + $0x198] sm:$0xff]  ;;  %v1589_v59 = vld [vmem:[#allocation2 + $0x5e0] sm:$0xff] }
 0x11c   :  { %1130 = vmatpush.msra.mxu1 %v1569_v63  ;;  %1089 = vmatpush.msrb.mxu3 %v1571_v6  ;;  %v1590_v63 = vld [vmem:[#allocation2 + $0x160] sm:$0xff]  ;;  %v1591_v5 = vld [vmem:[#allocation2 + $0x618] sm:$0xff] }
 0x11d   :  { %1072 = vmatpush.msrb.mxu2 %v1572_v9  ;;  %1113 = vmatpush.msra.mxu0 %v1574_v49  ;;  %v1592_v6 = vld [vmem:[#allocation2 + $0x158] sm:$0xff]  ;;  %v1593_v9 = vld [vmem:[#allocation2 + $0x5a0] sm:$0xff] }
 0x11e   :  { %1131 = vmatpush.msra.mxu1 %v1573_v13  ;;  %1090 = vmatpush.msrb.mxu3 %v1575_v50  ;;  %v1594_v13 = vld [vmem:[#allocation2 + $0x5d8] sm:$0xff]  ;;  %v1596_v50 = vld [vmem:[#allocation2 + $0x560] sm:$0xff] }
 0x11f   :  { %1073 = vmatpush.msrb.mxu2 %v1576_v15  ;;  %1114 = vmatpush.msra.mxu0 %v1578_v18  ;;  %v1595_v49 = vld [vmem:[#allocation2 + $0x118] sm:$0xff]  ;;  %v1599_v18 = vld [vmem:[#allocation2 + $0x120] sm:$0xff] }
 0x120   :  { %1132 = vmatpush.msra.mxu1 %v1577_v16  ;;  %1091 = vmatpush.msrb.mxu3 %v1579_v19  ;;  %v1597_v15 = vld [vmem:[#allocation2 + $0x598] sm:$0xff]  ;;  %v1600_v19 = vld [vmem:[#allocation2 + $0x520] sm:$0xff] }
 0x121   :  { %1074 = vmatpush.msrb.mxu2 %v1580_v21  ;;  %1115 = vmatpush.msra.mxu0 %v1582_v26  ;;  %v1598_v16 = vld [vmem:[#allocation2 + $0xd8] sm:$0xff]  ;;  %v1603_v26 = vld [vmem:[#allocation2 + $0xe0] sm:$0xff] }
 0x122   :  { %1133 = vmatpush.msra.mxu1 %v1581_v25  ;;  %1092 = vmatpush.msrb.mxu3 %v1583_v35  ;;  %v1601_v21 = vld [vmem:[#allocation2 + $0x558] sm:$0xff]  ;;  %v1604_v35 = vld [vmem:[#allocation2 + $0x4e0] sm:$0xff] }
 0x123   :  { %1075 = vmatpush.msrb.mxu2 %v1584_v37  ;;  %1116 = vmatpush.msra.mxu0 %v1586_v48  ;;  %v1602_v25 = vld [vmem:[#allocation2 + $0x98] sm:$0xff]  ;;  %v1607_v48 = vld [vmem:[#allocation2 + $0xa0] sm:$0xff] }
 0x124   :  { %1134 = vmatpush.msra.mxu1 %v1585_v43  ;;  %1093 = vmatpush.msrb.mxu3 %v1587_v52  ;;  %v1605_v37 = vld [vmem:[#allocation2 + $0x518] sm:$0xff]  ;;  %v1608_v52 = vld [vmem:[#allocation2 + $0x4a0] sm:$0xff] }
 0x125   :  { %1076 = vmatpush.msrb.mxu2 %v1588_v54  ;;  %1117 = vmatpush.msra.mxu0 %v1590_v63  ;;  %v1606_v43 = vld [vmem:[#allocation2 + $0x58] sm:$0xff]  ;;  %v1611_v63 = vld [vmem:[#allocation2 + $0x60] sm:$0xff] }
 0x126   :  { %1135 = vmatpush.msra.mxu1 %v1589_v59  ;;  %1094 = vmatpush.msrb.mxu3 %v1591_v5  ;;  %v1609_v54 = vld [vmem:[#allocation2 + $0x4d8] sm:$0xff]  ;;  %v1612_v5 = vld [vmem:[#allocation2 + $0x460] sm:$0xff] }
 0x127   :  { %1077 = vmatpush.msrb.mxu2 %v1592_v6  ;;  %1023 = vmatmul.f32.vlgmr.msra.gmra.mxu3 %v2402_v24  ;;  %v1610_v59 = vld [vmem:[#allocation2 + $0x18] sm:$0xff] }
 0x128   :  { %1136 = vmatpush.msra.mxu1 %v1593_v9  ;;  %1003 = vmatmul.f32.vlgmr.msra.gmra.mxu2 %v2404_v30  ;;  %v1613_v6 = vld [vmem:[#allocation2 + $0x498] sm:$0xff]  ;;  %v1614_v9 = vld [vmem:[#allocation2 + $0x3e8] sm:$0xff] }
 0x129   :  { %1095 = vmatpush.msrb.mxu3 %v1594_v13  ;;  %1078 = vmatpush.msrb.mxu2 %v1595_v49  ;;  %v1615_v13 = vld [vmem:[#allocation2 + $0x20] sm:$0xff]  ;;  %v1616_v49 = vld [vmem:[#allocation2 + $0x458] sm:$0xff] }
 0x12a   :  { %1137 = vmatpush.msra.mxu1 %v1596_v50  ;;  %1118 = vmatpush.msra.mxu0 %v1599_v18  ;;  %v1617_v50 = vld [vmem:[#allocation2 + $0x420] sm:$0xff]  ;;  %v1620_v18 = vld [vmem:[#allocation2 + $0x418] sm:$0xff] }
 0x12b   :  { %1096 = vmatpush.msrb.mxu3 %v1597_v15  ;;  %1079 = vmatpush.msrb.mxu2 %v1598_v16  ;;  %v1618_v15 = vld [vmem:[#allocation2 + $0x3a8] sm:$0xff]  ;;  %v1619_v16 = vld [vmem:[#allocation2 + $0x3f0] sm:$0xff] }
 0x12c   :  { %1138 = vmatpush.msra.mxu1 %v1600_v19  ;;  %1119 = vmatpush.msra.mxu0 %v1603_v26  ;;  %v1621_v19 = vld [vmem:[#allocation2 + $0x7f0] sm:$0xff] }
 0x12d   :  { %1097 = vmatpush.msrb.mxu3 %v1601_v21  ;;  %1080 = vmatpush.msrb.mxu2 %v1602_v25  ;;  %v1622_v21 = vld [vmem:[#allocation2 + $0x368] sm:$0xff]  ;;  %v1624_v26 = vld [vmem:[#allocation2 + $0x3b0] sm:$0xff] }
 0x12e   :  { %1139 = vmatpush.msra.mxu1 %v1604_v35  ;;  %1120 = vmatpush.msra.mxu0 %v1607_v48  ;;  %v1623_v25 = vld [vmem:[#allocation2 + $0x7e8] sm:$0xff]  ;;  %v1625_v35 = vld [vmem:[#allocation2 + $0x7b0] sm:$0xff] }
 0x12f   :  { %1098 = vmatpush.msrb.mxu3 %v1605_v37  ;;  %1081 = vmatpush.msrb.mxu2 %v1606_v43  ;;  %v1626_v37 = vld [vmem:[#allocation2 + $0x328] sm:$0xff]  ;;  %v1628_v48 = vld [vmem:[#allocation2 + $0x370] sm:$0xff] }
 0x130   :  { %1140 = vmatpush.msra.mxu1 %v1608_v52  ;;  %1121 = vmatpush.msra.mxu0 %v1611_v63  ;;  %v1627_v43 = vld [vmem:[#allocation2 + $0x7a8] sm:$0xff]  ;;  %v1629_v52 = vld [vmem:[#allocation2 + $0x770] sm:$0xff] }
 0x131   :  { %1099 = vmatpush.msrb.mxu3 %v1609_v54  ;;  %1082 = vmatpush.msrb.mxu2 %v1610_v59  ;;  %v1630_v54 = vld [vmem:[#allocation2 + $0x2e8] sm:$0xff]  ;;  %v1632_v63 = vld [vmem:[#allocation2 + $0x330] sm:$0xff] }
 0x132   :  { %1141 = vmatpush.msra.mxu1 %v1612_v5  ;;  %1083 = vmatmul.f32.vlgmr.msrb.gmra.mxu2 %v2404_v30  ;;  %v1631_v59 = vld [vmem:[#allocation2 + $0x768] sm:$0xff]  ;;  %v1633_v5 = vld [vmem:[#allocation2 + $0x730] sm:$0xff] }
 0x133   :  { %1100 = vmatpush.msrb.mxu3 %v1613_v6  ;;  %1147 = vmatpush.msra.mxu2 %v1614_v9  ;;  %v1634_v6 = vld [vmem:[#allocation2 + $0x2a8] sm:$0xff] }
 0x134   :  { %1122 = vmatpush.msra.mxu0 %v1615_v13  ;;  %1142 = vmatpush.msra.mxu1 %v1617_v50  ;;  %v1635_v9 = vld [vmem:[#allocation2 + $0x728] sm:$0xff]  ;;  %v1636_v13 = vld [vmem:[#allocation2 + $0x2f0] sm:$0xff] }
 0x135   :  { %1101 = vmatpush.msrb.mxu3 %v1616_v49  ;;  %1148 = vmatpush.msra.mxu2 %v1618_v15  ;;  %v1637_v49 = vld [vmem:[#allocation2 + $0x6f0] sm:$0xff]  ;;  %v1638_v50 = vld [vmem:[#allocation2 + $0x268] sm:$0xff] }
 0x136   :  { %1187 = vmatpush.msrb.mxu0 %v1619_v16  ;;  %1207 = vmatpush.msrb.mxu1 %v1621_v19  ;;  %v1639_v15 = vld [vmem:[#allocation2 + $0x6e8] sm:$0xff]  ;;  %v1640_v16 = vld [vmem:[#allocation2 + $0x2b0] sm:$0xff]  ;;  %v2424_v19 = vld [vmem:[%s2788_s4] sm:$0x1] }
 0x137   :  { %1102 = vmatpush.msrb.mxu3 %v1620_v18  ;;  %1149 = vmatpush.msra.mxu2 %v1622_v21  ;;  %v1641_v18 = vld [vmem:[#allocation2 + $0x6b0] sm:$0xff]  ;;  %v1642_v21 = vld [vmem:[#allocation2 + $0x6a8] sm:$0xff] }
 0x138   :  { %1103 = vmatmul.f32.vlgmr.msrb.gmra.mxu3 %v2402_v24  ;;  %1188 = vmatpush.msrb.mxu0 %v1624_v26  ;;  %v1644_v26 = vld [vmem:[#allocation2 + $0x270] sm:$0xff] }
 0x139   :  { %1167 = vmatpush.msra.mxu3 %v1623_v25  ;;  %1208 = vmatpush.msrb.mxu1 %v1625_v35  ;;  %v1643_v25 = vld [vmem:[#allocation2 + $0x228] sm:$0xff] }
 0x13a   :  { %1150 = vmatpush.msra.mxu2 %v1626_v37  ;;  %1189 = vmatpush.msrb.mxu0 %v1628_v48  ;;  %v1645_v37 = vld [vmem:[#allocation2 + $0x668] sm:$0xff] }
 0x13b   :  { %1168 = vmatpush.msra.mxu3 %v1627_v43  ;;  %1209 = vmatpush.msrb.mxu1 %v1629_v52  ;;  %v1646_v43 = vld [vmem:[#allocation2 + $0x670] sm:$0xff]  ;;  %v1647_v52 = vld [vmem:[#allocation2 + $0x1e8] sm:$0xff] }
 0x13c   :  { %1151 = vmatpush.msra.mxu2 %v1630_v54  ;;  %1190 = vmatpush.msrb.mxu0 %v1632_v63  ;;  %v1648_v54 = vld [vmem:[#allocation2 + $0x230] sm:$0xff]  ;;  %v1649_v63 = vld [vmem:[#allocation2 + $0x628] sm:$0xff] }
 0x13d   :  { %1169 = vmatpush.msra.mxu3 %v1631_v59  ;;  %1210 = vmatpush.msrb.mxu1 %v1633_v5  ;;  %v1650_v5 = vld [vmem:[#allocation2 + $0x630] sm:$0xff] }
 0x13e   :  { %1152 = vmatpush.msra.mxu2 %v1634_v6  ;;  %1191 = vmatpush.msrb.mxu0 %v1636_v13  ;;  %v1652_v13 = vld [vmem:[#allocation2 + $0x1f0] sm:$0xff] }
 0x13f   :  { %1170 = vmatpush.msra.mxu3 %v1635_v9  ;;  %1211 = vmatpush.msrb.mxu1 %v1637_v49  ;;  %v1651_v9 = vld [vmem:[#allocation2 + $0x1a8] sm:$0xff] }
 0x140   :  { %1153 = vmatpush.msra.mxu2 %v1638_v50  ;;  %1192 = vmatpush.msrb.mxu0 %v1640_v16  ;;  %v1653_v49 = vld [vmem:[#allocation2 + $0x5e8] sm:$0xff]  ;;  %v1654_v50 = vld [vmem:[#allocation2 + $0x5f0] sm:$0xff] }
 0x141   :  { %1171 = vmatpush.msra.mxu3 %v1639_v15  ;;  %1212 = vmatpush.msrb.mxu1 %v1641_v18  ;;  %v1655_v15 = vld [vmem:[#allocation2 + $0x168] sm:$0xff]  ;;  %v1656_v16 = vld [vmem:[#allocation2 + $0x1b0] sm:$0xff] }
 0x142   :  { %1123 = vmatmul.f32.vlgmr.msra.gmra.mxu0 %v2404_v30  ;;  %1143 = vmatmul.f32.vlgmr.msra.gmra.mxu1 %v2402_v24  ;;  %v798_v35 = vpop.f32.mrf.mxu0  ;;  %v1657_v18 = vld [vmem:[#allocation2 + $0x5a8] sm:$0xff] }
 0x143   :  { %1172 = vmatpush.msra.mxu3 %v1642_v21  ;;  %1154 = vmatpush.msra.mxu2 %v1643_v25  ;;  %v799_v48 = vadd.f32 %v798_v35, %v2424_v19  ;;  %v1658_v21 = vld [vmem:[#allocation2 + $0x5b0] sm:$0xff]  ;;  %v1659_v25 = vld [vmem:[#allocation2 + $0x128] sm:$0xff] }
 0x144   :  { %1193 = vmatpush.msrb.mxu0 %v1644_v26  ;;  %1213 = vmatpush.msrb.mxu1 %v1646_v43  ;;  %v1660_v26 = vld [vmem:[#allocation2 + $0x170] sm:$0xff]  ;;  %v1661_v35 = vld [vmem:[#allocation2 + $0x568] sm:$0xff] }
 0x145   :  { %1173 = vmatpush.msra.mxu3 %v1645_v37  ;;  %1155 = vmatpush.msra.mxu2 %v1647_v52  ;;  %v1662_v37 = vld [vmem:[#allocation2 + $0x570] sm:$0xff]  ;;  %v1663_v43 = vld [vmem:[#allocation2 + $0xe8] sm:$0xff] }
 0x146   :  { %1194 = vmatpush.msrb.mxu0 %v1648_v54  ;;  %v818_v59 = vpop.f32.mrf.mxu1  ;;  %1214 = vmatpush.msrb.mxu1 %v1650_v5  ;;  %v1665_v52 = vld [vmem:[#allocation2 + $0x528] sm:$0xff]  ;;  %v1666_v54 = vld [vmem:[#allocation2 + $0x530] sm:$0xff] }
 0x147   :  { %1174 = vmatpush.msra.mxu3 %v1649_v63  ;;  %v819_v6 = vadd.f32 %v818_v59, %v799_v48  ;;  %1156 = vmatpush.msra.mxu2 %v1651_v9  ;;  %v1664_v48 = vld [vmem:[#allocation2 + $0x130] sm:$0xff]  ;;  %v1667_v59 = vld [vmem:[#allocation2 + $0xa8] sm:$0xff] }
 0x148   :  { %1195 = vmatpush.msrb.mxu0 %v1652_v13  ;;  %1215 = vmatpush.msrb.mxu1 %v1654_v50  ;;  %v1668_v63 = vld [vmem:[#allocation2 + $0xf0] sm:$0xff]  ;;  %v1669_v5 = vld [vmem:[#allocation2 + $0x4e8] sm:$0xff] }
 0x149   :  { %1175 = vmatpush.msra.mxu3 %v1653_v49  ;;  %1157 = vmatpush.msra.mxu2 %v1655_v15  ;;  %v1670_v9 = vld [vmem:[#allocation2 + $0x4f0] sm:$0xff]  ;;  %v1671_v13 = vld [vmem:[#allocation2 + $0x68] sm:$0xff] }
 0x14a   :  { %1196 = vmatpush.msrb.mxu0 %v1656_v16  ;;  %1216 = vmatpush.msrb.mxu1 %v1658_v21  ;;  %v1672_v49 = vld [vmem:[#allocation2 + $0xb0] sm:$0xff]  ;;  %v1673_v50 = vld [vmem:[#allocation2 + $0x4a8] sm:$0xff] }
 0x14b   :  { %1176 = vmatpush.msra.mxu3 %v1657_v18  ;;  %1158 = vmatpush.msra.mxu2 %v1659_v25  ;;  %v1674_v15 = vld [vmem:[#allocation2 + $0x4b0] sm:$0xff]  ;;  %v1675_v18 = vld [vmem:[#allocation2 + $0x28] sm:$0xff] }
 0x14c   :  { %1197 = vmatpush.msrb.mxu0 %v1660_v26  ;;  %1217 = vmatpush.msrb.mxu1 %v1662_v37  ;;  %v1676_v21 = vld [vmem:[#allocation2 + $0x70] sm:$0xff]  ;;  %v1677_v26 = vld [vmem:[#allocation2 + $0x468] sm:$0xff] }
 0x14d   :  { %1177 = vmatpush.msra.mxu3 %v1661_v35  ;;  %1159 = vmatpush.msra.mxu2 %v1663_v43  ;;  %v1678_v35 = vld [vmem:[#allocation2 + $0x470] sm:$0xff]  ;;  %v1680_v43 = vld [vmem:[#allocation2 + $0x428] sm:$0xff] }
 0x14e   :  { %1198 = vmatpush.msrb.mxu0 %v1664_v48  ;;  %1218 = vmatpush.msrb.mxu1 %v1666_v54  ;;  %v1679_v37 = vld [vmem:[#allocation2 + $0x30] sm:$0xff]  ;;  %v1681_v48 = vld [vmem:[#allocation2 + $0x3f8] sm:$0xff] }
 0x14f   :  { %1178 = vmatpush.msra.mxu3 %v1665_v52  ;;  %1160 = vmatpush.msra.mxu2 %v1667_v59  ;;  %v1682_v52 = vld [vmem:[#allocation2 + $0x430] sm:$0xff]  ;;  %v1683_v54 = vld [vmem:[#allocation2 + $0x7f8] sm:$0xff] }
 0x150   :  { %1199 = vmatpush.msrb.mxu0 %v1668_v63  ;;  %1219 = vmatpush.msrb.mxu1 %v1670_v9  ;;  %v1685_v59 = vld [vmem:[#allocation2 + $0x7b8] sm:$0xff] }
 0x151   :  { %1179 = vmatpush.msra.mxu3 %v1669_v5  ;;  %1161 = vmatpush.msra.mxu2 %v1671_v13  ;;  %v1686_v63 = vld [vmem:[%s2787_s3 + $0x78] sm:$0xff] }
 0x152   :  { %1200 = vmatpush.msrb.mxu0 %v1672_v49  ;;  %1220 = vmatpush.msrb.mxu1 %v1674_v15  ;;  %v838_v16 = vpop.f32.mrf.mxu2  ;;  %v1687_v5 = vld [vmem:[#allocation2 + $0x378] sm:$0xff]  ;;  %v1690_v49 = vld [vmem:[%s2787_s3 + $0x70] sm:$0xff] }
 0x153   :  { %1180 = vmatpush.msra.mxu3 %v1673_v50  ;;  %1162 = vmatpush.msra.mxu2 %v1675_v18  ;;  %v2428_v25 = vadd.f32 %v838_v16, %v819_v6  ;;  %v1684_v6 = vld [vmem:[#allocation2 + $0x3b8] sm:$0xff]  ;;  %v1692_v15 = vld [vmem:[%s2787_s3 + $0xf0] sm:$0xff]  ;;  %v1694_v18 = vld [vmem:[%s2787_s3 + $0x68] sm:$0xff] }
 0x154   :  { %1201 = vmatpush.msrb.mxu0 %v1676_v21  ;;  %1221 = vmatpush.msrb.mxu1 %v1678_v35  ;;  %v1688_v9 = vld [vmem:[%s2787_s3 + $0xf8] sm:$0xff] }
 0x155   :  { %1181 = vmatpush.msra.mxu3 %v1677_v26  ;;  %1163 = vmatmul.f32.vlgmr.msra.gmra.mxu2 %v2404_v30  ;;  %v1689_v13 = vld [vmem:[#allocation2 + $0x778] sm:$0xff]  ;;  %v1696_v26 = vld [vmem:[%s2787_s3 + $0xe8] sm:$0xff] }
 0x156   :  { %1202 = vmatpush.msrb.mxu0 %v1679_v37  ;;  %1227 = vmatpush.msrb.mxu2 %v1681_v48  ;;  %v1691_v50 = vld [vmem:[#allocation2 + $0x338] sm:$0xff]  ;;  %v1698_v37 = vld [vmem:[%s2787_s3 + $0x60] sm:$0xff] }
 0x157   :  { %1182 = vmatpush.msra.mxu3 %v1680_v43  ;;  %1222 = vmatpush.msrb.mxu1 %v1682_v52  ;;  %v1693_v16 = vld [vmem:[#allocation2 + $0x738] sm:$0xff]  ;;  %v1700_v48 = vld [vmem:[%s2787_s3 + $0xe0] sm:$0xff] }
 0x158   :  { %1183 = vmatmul.f32.vlgmr.msra.gmra.mxu3 %v2402_v24  ;;  %1203 = vmatmul.f32.vlgmr.msrb.gmra.mxu0 %v2404_v30  ;;  %v1695_v21 = vld [vmem:[#allocation2 + $0x2f8] sm:$0xff] }
 0x159   :  { %1247 = vmatpush.msrb.mxu3 %v1683_v54  ;;  %1223 = vmatmul.f32.vlgmr.msrb.gmra.mxu1 %v2402_v24  ;;  %v1697_v35 = vld [vmem:[#allocation2 + $0x6f8] sm:$0xff] }
 0x15a   :  { %1228 = vmatpush.msrb.mxu2 %v1684_v6  ;;  %1283 = vmatpush.msra.mxu0 %v1686_v63  ;;  %v1699_v43 = vld [vmem:[#allocation2 + $0x2b8] sm:$0xff] }
 0x15b   :  { %1248 = vmatpush.msrb.mxu3 %v1685_v59  ;;  %1303 = vmatpush.msra.mxu1 %v1688_v9  ;;  %v1701_v52 = vld [vmem:[#allocation2 + $0x6b8] sm:$0xff] }
 0x15c   :  { %1229 = vmatpush.msrb.mxu2 %v1687_v5  ;;  %1284 = vmatpush.msra.mxu0 %v1690_v49  ;;  %v1702_v54 = vld [vmem:[%s2787_s3 + $0x58] sm:$0xff]  ;;  %v1706_v5 = vld [vmem:[%s2787_s3 + $0x50] sm:$0xff] }
 0x15d   :  { %1249 = vmatpush.msrb.mxu3 %v1689_v13  ;;  %1304 = vmatpush.msra.mxu1 %v1692_v15  ;;  %v1703_v6 = vld [vmem:[#allocation2 + $0x278] sm:$0xff]  ;;  %v1708_v13 = vld [vmem:[%s2787_s3 + $0xd0] sm:$0xff]  ;;  %v858_v15 = vpop.f32.mrf.mxu3 }
 0x15e   :  { %1230 = vmatpush.msrb.mxu2 %v1691_v50  ;;  %1285 = vmatpush.msra.mxu0 %v1694_v18  ;;  %v1704_v59 = vld [vmem:[%s2787_s3 + $0xd8] sm:$0xff]  ;;  %v1710_v50 = vld [vmem:[%s2787_s3 + $0x48] sm:$0xff] }
 0x15f   :  { %1250 = vmatpush.msrb.mxu3 %v1693_v16  ;;  %1305 = vmatpush.msra.mxu1 %v1696_v26  ;;  %v1705_v63 = vld [vmem:[#allocation2 + $0x678] sm:$0xff]  ;;  %v1712_v18 = vld [vmem:[%s2787_s3 + $0xc8] sm:$0xff]  ;;  %v1714_v26 = vld [vmem:[%s2787_s3 + $0x40] sm:$0xff] }
 0x160   :  { %1231 = vmatpush.msrb.mxu2 %v1695_v21  ;;  %1286 = vmatpush.msra.mxu0 %v1698_v37  ;;  %v1707_v9 = vld [vmem:[#allocation2 + $0x238] sm:$0xff]  ;;  %v1716_v37 = vld [vmem:[%s2787_s3 + $0xc0] sm:$0xff] }
 0x161   :  { %1251 = vmatpush.msrb.mxu3 %v1697_v35  ;;  %1306 = vmatpush.msra.mxu1 %v1700_v48  ;;  %v1709_v49 = vld [vmem:[#allocation2 + $0x638] sm:$0xff] }
 0x162   :  { %1232 = vmatpush.msrb.mxu2 %v1699_v43  ;;  %1287 = vmatpush.msra.mxu0 %v1702_v54  ;;  %v1711_v16 = vld [vmem:[#allocation2 + $0x1f8] sm:$0xff]  ;;  %v859_v43 = vadd.f32 %v858_v15, %v2428_v25  ;;  %v1722_v25 = vld [vmem:[%s2787_s3 + $0x30] sm:$0xff] }
 0x163   :  { %1252 = vmatpush.msrb.mxu3 %v1701_v52  ;;  %1307 = vmatpush.msra.mxu1 %v1704_v59  ;;  %v1713_v21 = vld [vmem:[#allocation2 + $0x5f8] sm:$0xff] }
 0x164   :  { %1233 = vmatpush.msrb.mxu2 %v1703_v6  ;;  %1288 = vmatpush.msra.mxu0 %v1706_v5  ;;  %v1715_v35 = vld [vmem:[#allocation2 + $0x1b8] sm:$0xff] }
 0x165   :  { %1253 = vmatpush.msrb.mxu3 %v1705_v63  ;;  %1308 = vmatpush.msra.mxu1 %v1708_v13  ;;  %v1717_v48 = vld [vmem:[#allocation2 + $0x5b8] sm:$0xff]  ;;  %v1724_v13 = vld [vmem:[%s2787_s3 + $0xb0] sm:$0xff] }
 0x166   :  { %1234 = vmatpush.msrb.mxu2 %v1707_v9  ;;  %1289 = vmatpush.msra.mxu0 %v1710_v50  ;;  %v1718_v52 = vld [vmem:[%s2787_s3 + $0x38] sm:$0xff]  ;;  %v1726_v50 = vld [vmem:[%s2787_s3 + $0x28] sm:$0xff] }
 0x167   :  { %1254 = vmatpush.msrb.mxu3 %v1709_v49  ;;  %1309 = vmatpush.msra.mxu1 %v1712_v18  ;;  %v1719_v54 = vld [vmem:[#allocation2 + $0x178] sm:$0xff] }
 0x168   :  { %1235 = vmatpush.msrb.mxu2 %v1711_v16  ;;  %1290 = vmatpush.msra.mxu0 %v1714_v26  ;;  %v1720_v59 = vld [vmem:[%s2787_s3 + $0xb8] sm:$0xff]  ;;  %v1728_v16 = vld [vmem:[%s2787_s3 + $0xa8] sm:$0xff] }
 0x169   :  { %1255 = vmatpush.msrb.mxu3 %v1713_v21  ;;  %1310 = vmatpush.msra.mxu1 %v1716_v37  ;;  %v1721_v63 = vld [vmem:[#allocation2 + $0x578] sm:$0xff]  ;;  %v1730_v21 = vld [vmem:[%s2787_s3 + $0x20] sm:$0xff] }
 0x16a   :  { %1236 = vmatpush.msrb.mxu2 %v1715_v35  ;;  %1291 = vmatpush.msra.mxu0 %v1718_v52  ;;  %v1723_v9 = vld [vmem:[#allocation2 + $0x138] sm:$0xff]  ;;  %v1732_v35 = vld [vmem:[%s2787_s3 + $0xa0] sm:$0xff] }
 0x16b   :  { %1256 = vmatpush.msrb.mxu3 %v1717_v48  ;;  %v878_v6 = vpop.f32.mrf.mxu0  ;;  %1311 = vmatpush.msra.mxu1 %v1720_v59  ;;  %v1725_v49 = vld [vmem:[#allocation2 + $0x538] sm:$0xff] }
 0x16c   :  { %1237 = vmatpush.msrb.mxu2 %v1719_v54  ;;  %v879_v5 = vadd.f32 %v878_v6, %v859_v43  ;;  %1292 = vmatpush.msra.mxu0 %v1722_v25  ;;  %v1727_v15 = vld [vmem:[#allocation2 + $0xf8] sm:$0xff] }
 0x16d   :  { %1257 = vmatpush.msrb.mxu3 %v1721_v63  ;;  %1312 = vmatpush.msra.mxu1 %v1724_v13  ;;  %v1729_v18 = vld [vmem:[#allocation2 + $0x4f8] sm:$0xff]  ;;  %v1738_v63 = vld [vmem:[%s2787_s3 + $0x10] sm:$0xff] }
 0x16e   :  { %1238 = vmatpush.msrb.mxu2 %v1723_v9  ;;  %1293 = vmatpush.msra.mxu0 %v1726_v50  ;;  %v1731_v26 = vld [vmem:[#allocation2 + $0xb8] sm:$0xff]  ;;  %v1740_v9 = vld [vmem:[%s2787_s3 + $0x90] sm:$0xff]  ;;  %v1744_v50 = vld [vmem:[%s2787_s3 + $0x8] sm:$0xff] }
 0x16f   :  { %1258 = vmatpush.msrb.mxu3 %v1725_v49  ;;  %1313 = vmatpush.msra.mxu1 %v1728_v16  ;;  %v1733_v37 = vld [vmem:[#allocation2 + $0x4b8] sm:$0xff]  ;;  %v1748_v16 = vld [vmem:[%s2787_s3] sm:$0xff] }
 0x170   :  { %1239 = vmatpush.msrb.mxu2 %v1727_v15  ;;  %1294 = vmatpush.msra.mxu0 %v1730_v21  ;;  %v1734_v48 = vld [vmem:[%s2787_s3 + $0x18] sm:$0xff]  ;;  %v1747_v15 = vld [vmem:[%s2787_s3 + $0x1f0] sm:$0xff] }
 0x171   :  { %1259 = vmatpush.msrb.mxu3 %v1729_v18  ;;  %1314 = vmatpush.msra.mxu1 %v1732_v35  ;;  %v1735_v52 = vld [vmem:[#allocation2 + $0x78] sm:$0xff]  ;;  %v1749_v18 = vld [vmem:[%s2787_s3 + $0x168] sm:$0xff] }
 0x172   :  { %1240 = vmatpush.msrb.mxu2 %v1731_v26  ;;  %v898_v43 = vpop.f32.mrf.mxu1  ;;  %1295 = vmatpush.msra.mxu0 %v1734_v48  ;;  %v1736_v6 = vld [vmem:[%s2787_s3 + $0x98] sm:$0xff]  ;;  %v1752_v48 = vld [vmem:[%s2787_s3 + $0x80] sm:$0xff] }
 0x173   :  { %1260 = vmatpush.msrb.mxu3 %v1733_v37  ;;  %v2510_v54 = vadd.f32 %v898_v43, %v879_v5  ;;  %1315 = vmatpush.msra.mxu1 %v1736_v6  ;;  %v1737_v59 = vld [vmem:[#allocation2 + $0x478] sm:$0xff]  ;;  %v1751_v37 = vld [vmem:[%s2787_s3 + $0x1e8] sm:$0xff]  ;;  %v1754_v6 = vld [vmem:[%s2787_s3 + $0x270] sm:$0xff] }
 0x174   :  { %1241 = vmatpush.msrb.mxu2 %v1735_v52  ;;  %1296 = vmatpush.msra.mxu0 %v1738_v63  ;;  %v1739_v25 = vld [vmem:[#allocation2 + $0x38] sm:$0xff]  ;;  %v1753_v52 = vld [vmem:[%s2787_s3 + $0x160] sm:$0xff] }
 0x175   :  { %1261 = vmatpush.msrb.mxu3 %v1737_v59  ;;  %1316 = vmatpush.msra.mxu1 %v1740_v9  ;;  %v1741_v5 = vld [vmem:[#allocation2 + $0x438] sm:$0xff]  ;;  %v964_v26 = vpop.f32.mrf.mxu0  ;;  %v1755_v59 = vld [vmem:[%s2787_s3 + $0x1e0] sm:$0xff] }
 0x176   :  { %1242 = vmatpush.msrb.mxu2 %v1739_v25  ;;  %v1742_v13 = vld [vmem:[%s2787_s3 + $0x178] sm:$0xff]  ;;  %1297 = vmatpush.msra.mxu0 %v1744_v50  ;;  %v1761_v50 = vld [vmem:[%s2787_s3 + $0x150] sm:$0xff] }
 0x177   :  { %1262 = vmatpush.msrb.mxu3 %v1741_v5  ;;  %1243 = vmatmul.f32.vlgmr.msrb.gmra.mxu2 %v2404_v30  ;;  %v1743_v49 = vld [vmem:[%s2787_s3 + $0x1f8] sm:$0xff]  ;;  %v1745_v30 = vld [vmem:[%s2787_s3 + $0x170] sm:$0xff]  ;;  %v1758_v5 = vld [vmem:[%s2787_s3 + $0x268] sm:$0xff] }
 0x178   :  { %1263 = vmatmul.f32.vlgmr.msrb.gmra.mxu3 %v2402_v24  ;;  %1323 = vmatpush.msra.mxu2 %v1742_v13  ;;  %v1746_v24 = vld [vmem:[%s2787_s3 + $0x88] sm:$0xff]  ;;  %v1750_v21 = vld [vmem:[%s2787_s3 + $0x278] sm:$0xff] }
 0x179   :  { %1343 = vmatpush.msra.mxu3 %v1743_v49  ;;  %1317 = vmatpush.msra.mxu1 %v1746_v24  ;;  %v1756_v25 = vld [vmem:[%s2787_s3 + $0x2f8] sm:$0xff]  ;;  %v1760_v49 = vld [vmem:[%s2787_s3 + $0x2f0] sm:$0xff] }
 0x17a   :  { %1324 = vmatpush.msra.mxu2 %v1745_v30  ;;  %1298 = vmatpush.msra.mxu0 %v1748_v16  ;;  %v984_v35 = vpop.f32.mrf.mxu1  ;;  %v1757_v9 = vld [vmem:[%s2787_s3 + $0x158] sm:$0xff]  ;;  %v1762_v30 = vld [vmem:[%s2787_s3 + $0x260] sm:$0xff]  ;;  %v1763_v24 = vld [vmem:[%s2787_s3 + $0x1d0] sm:$0xff] }
 0x17b   :  { %1344 = vmatpush.msra.mxu3 %v1747_v15  ;;  %v985_v43 = vadd.f32 %v984_v35, %v964_v26  ;;  %1318 = vmatpush.msra.mxu1 %v1752_v48  ;;  %v1759_v13 = vld [vmem:[%s2787_s3 + $0x1d8] sm:$0xff]  ;;  %v1764_v15 = vld [vmem:[%s2787_s3 + $0x148] sm:$0xff]  ;;  %v1768_v26 = vld [vmem:[%s2787_s3 + $0x140] sm:$0xff] }
 0x17c   :  { %1325 = vmatpush.msra.mxu2 %v1749_v18  ;;  %1363 = vmatpush.msrb.mxu0 %v1750_v21  ;;  %v1765_v16 = vld [vmem:[%s2787_s3 + $0x258] sm:$0xff]  ;;  %v1766_v18 = vld [vmem:[%s2787_s3 + $0x1c8] sm:$0xff]  ;;  %v1769_v35 = vld [vmem:[%s2787_s3 + $0x250] sm:$0xff] }
 0x17d   :  { %1345 = vmatpush.msra.mxu3 %v1751_v37  ;;  %v1267_v63 = vsub.f32 %v985_v43, %v749_v34  ;;  %1383 = vmatpush.msrb.mxu1 %v1756_v25  ;;  %v1767_v21 = vld [vmem:[%s2787_s3 + $0x2e8] sm:$0xff]  ;;  %v1770_v37 = vld [vmem:[%s2787_s3 + $0x1c0] sm:$0xff]  ;;  %v1772_v48 = vld [vmem:[%s2787_s3 + $0x138] sm:$0xff] }
 0x17e   :  { %1326 = vmatpush.msra.mxu2 %v1753_v52  ;;  %1364 = vmatpush.msrb.mxu0 %v1754_v6  ;;  %v1771_v43 = vld [vmem:[%s2787_s3 + $0x2e0] sm:$0xff]  ;;  %v1773_v52 = vld [vmem:[%s2787_s3 + $0x248] sm:$0xff]  ;;  %v1774_v6 = vld [vmem:[%s2787_s3 + $0x1b8] sm:$0xff] }
 0x17f   :  { %1346 = vmatpush.msra.mxu3 %v1755_v59  ;;  %v1275_v34 = vmul.f32 %v1267_v63, %v1267_v63  ;;  %1384 = vmatpush.msrb.mxu1 %v1760_v49  ;;  %v1775_v59 = vld [vmem:[%s2787_s3 + $0x2d8] sm:$0xff]  ;;  %v1776_v63 = vld [vmem:[%s2787_s3 + $0x130] sm:$0xff]  ;;  %v1777_v25 = vld [vmem:[%s2787_s3 + $0x240] sm:$0xff] }
 0x180   :  { %1327 = vmatpush.msra.mxu2 %v1757_v9  ;;  %1365 = vmatpush.msrb.mxu0 %v1758_v5  ;;  %v1778_v9 = vld [vmem:[%s2787_s3 + $0x1b0] sm:$0xff]  ;;  %v1782_v49 = vld [vmem:[%s2787_s3 + $0x2c8] sm:$0xff] }
 0x181   :  { %1347 = vmatpush.msra.mxu3 %v1759_v13  ;;  %1299 = vmatmul.f32.vlgmr.msra.gmra.mxu0 %v1275_v34  ;;  %v1779_v5 = vld [vmem:[%s2787_s3 + $0x2d0] sm:$0xff]  ;;  %v1780_v13 = vld [vmem:[%s2787_s3 + $0x128] sm:$0xff] }
 0x182   :  { %1328 = vmatpush.msra.mxu2 %v1761_v50  ;;  %1366 = vmatpush.msrb.mxu0 %v1762_v30  ;;  %v1781_v34 = vld [vmem:[%s2787_s3 + $0x1a8] sm:$0xff]  ;;  %v1783_v50 = vld [vmem:[%s2787_s3 + $0x120] sm:$0xff] }
 0x183   :  { %1348 = vmatpush.msra.mxu3 %v1763_v24  ;;  %1385 = vmatpush.msrb.mxu1 %v1767_v21  ;;  %v1785_v30 = vld [vmem:[%s2787_s3 + $0x2c0] sm:$0xff]  ;;  %v1786_v24 = vld [vmem:[%s2787_s3 + $0x118] sm:$0xff]  ;;  %v1791_v21 = vld [vmem:[%s2787_s3 + $0x2b0] sm:$0xff] }
 0x184   :  { %1329 = vmatpush.msra.mxu2 %v1764_v15  ;;  %1367 = vmatpush.msrb.mxu0 %v1765_v16  ;;  %v1788_v15 = vld [vmem:[%s2787_s3 + $0x2b8] sm:$0xff] }
 0x185   :  { %1349 = vmatpush.msra.mxu3 %v1766_v18  ;;  %1386 = vmatpush.msrb.mxu1 %v1771_v43  ;;  %v1789_v18 = vld [vmem:[%s2787_s3 + $0x110] sm:$0xff] }
 0x186   :  { %1330 = vmatpush.msra.mxu2 %v1768_v26  ;;  %1368 = vmatpush.msrb.mxu0 %v1769_v35 }
 0x187   :  { %1350 = vmatpush.msra.mxu3 %v1770_v37  ;;  %1387 = vmatpush.msrb.mxu1 %v1775_v59  ;;  %v1792_v37 = vld [vmem:[%s2787_s3 + $0x108] sm:$0xff] }
 0x188   :  { %1331 = vmatpush.msra.mxu2 %v1772_v48  ;;  %1369 = vmatpush.msrb.mxu0 %v1773_v52  ;;  %v1793_v48 = vld [vmem:[%s2787_s3 + $0x188] sm:$0xff]  ;;  %v1794_v52 = vld [vmem:[%s2787_s3 + $0x100] sm:$0xff] }
 0x189   :  { %1351 = vmatpush.msra.mxu3 %v1774_v6  ;;  %1388 = vmatpush.msrb.mxu1 %v1779_v5  ;;  %v1796_v6 = vld [vmem:[%s2787_s3 + $0x180] sm:$0xff]  ;;  %v1807_v5 = vld [vmem:[%s2787_s3 + $0x3d0] sm:$0xff] }
 0x18a   :  { %1332 = vmatpush.msra.mxu2 %v1776_v63  ;;  %1370 = vmatpush.msrb.mxu0 %v1777_v25  ;;  %v1800_v63 = vld [vmem:[%s2787_s3 + $0x368] sm:$0xff]  ;;  %v1803_v25 = vld [vmem:[%s2787_s3 + $0x3e0] sm:$0xff] }
 0x18b   :  { %1352 = vmatpush.msra.mxu3 %v1778_v9  ;;  %1389 = vmatpush.msrb.mxu1 %v1782_v49  ;;  %v1044_v16 = vpop.f32.mrf.mxu0  ;;  %v1805_v9 = vld [vmem:[%s2787_s3 + $0x3d8] sm:$0xff] }
 0x18c   :  { %1333 = vmatpush.msra.mxu2 %v1780_v13  ;;  %1371 = vmatpush.msrb.mxu0 %v2157_v27  ;;  %v1784_v27 = vld [vmem:[%s2787_s3 + $0x1a0] sm:$0xff]  ;;  %v1808_v13 = vld [vmem:[%s2787_s3 + $0x348] sm:$0xff] }
 0x18d   :  { %1353 = vmatpush.msra.mxu3 %v1781_v34  ;;  %1390 = vmatpush.msrb.mxu1 %v1785_v30 }
 0x18e   :  { %1334 = vmatpush.msra.mxu2 %v1783_v50  ;;  %1372 = vmatpush.msrb.mxu0 %v2176_v32  ;;  %v1787_v32 = vld [vmem:[%s2787_s3 + $0x198] sm:$0xff] }
 0x18f   :  { %1354 = vmatpush.msra.mxu3 %v1784_v27  ;;  %1391 = vmatpush.msrb.mxu1 %v1788_v15 }
 0x190   :  { %1335 = vmatpush.msra.mxu2 %v1786_v24  ;;  %1373 = vmatpush.msrb.mxu0 %v2192_v39  ;;  %v1790_v39 = vld [vmem:[%s2787_s3 + $0x190] sm:$0xff] }
 0x191   :  { %1355 = vmatpush.msra.mxu3 %v1787_v32  ;;  %1392 = vmatpush.msrb.mxu1 %v1791_v21 }
 0x192   :  { %1336 = vmatpush.msra.mxu2 %v1789_v18  ;;  %1374 = vmatpush.msrb.mxu0 %v2210_v45 }
 0x193   :  { %1356 = vmatpush.msra.mxu3 %v1790_v39  ;;  %v918_v26 = vpop.f32.mrf.mxu2  ;;  %1393 = vmatpush.msrb.mxu1 %v2197_v40 }
 0x194   :  { %v1064_v35 = vpop.f32.mrf.mxu1  ;;  %1337 = vmatpush.msra.mxu2 %v1792_v37  ;;  %1375 = vmatpush.msrb.mxu0 %v2230_v55  ;;  %v919_v45 = vadd.f32 %v918_v26, %v2510_v54  ;;  %v1795_v54 = vld [vmem:[%s2787_s3 + $0x378] sm:$0xff] }
 0x195   :  { %v1065_v43 = vadd.f32 %v1064_v35, %v1044_v16  ;;  %1357 = vmatpush.msra.mxu3 %v1793_v48  ;;  %1394 = vmatpush.msrb.mxu1 %v2215_v46  ;;  %v1799_v46 = vld [vmem:[%s2787_s3 + $0x3f0] sm:$0xff] }
 0x196   :  { %1338 = vmatpush.msra.mxu2 %v1794_v52  ;;  %1376 = vmatpush.msrb.mxu0 %v2249_v60  ;;  %v1797_v60 = vld [vmem:[%s2787_s3 + $0x370] sm:$0xff] }
 0x197   :  { %v1269_v55 = vsub.f32 %v1065_v43, %v751_v2  ;;  %1358 = vmatpush.msra.mxu3 %v1796_v6  ;;  %v1798_v2 = vld [vmem:[%s2787_s3 + $0x3f8] sm:$0xff]  ;;  %1395 = vmatpush.msrb.mxu1 %v2235_v56  ;;  %v1801_v56 = vld [vmem:[%s2787_s3 + $0x3e8] sm:$0xff] }
 0x198   :  { %1403 = vmatpush.msrb.mxu2 %v1795_v54  ;;  %1377 = vmatpush.msrb.mxu0 %v2266_v0 }
 0x199   :  { %v1277_v40 = vmul.f32 %v1269_v55, %v1269_v55  ;;  %1423 = vmatpush.msrb.mxu3 %v1798_v2  ;;  %1396 = vmatpush.msrb.mxu1 %v2254_v61  ;;  %v1804_v61 = vld [vmem:[%s2787_s3 + $0x358] sm:$0xff] }
 0x19a   :  { %1404 = vmatpush.msrb.mxu2 %v1797_v60  ;;  %1378 = vmatpush.msrb.mxu0 %v2290_v7  ;;  %v938_v59 = vpop.f32.mrf.mxu3  ;;  %v1802_v7 = vld [vmem:[%s2787_s3 + $0x360] sm:$0xff] }
 0x19b   :  { %1339 = vmatmul.f32.vlgmr.msra.gmra.mxu2 %v1277_v40  ;;  %1424 = vmatpush.msrb.mxu3 %v1799_v46  ;;  %v2713_v0 = vadd.f32 %v938_v59, %v919_v45 }
 0x19c   :  { %1405 = vmatpush.msrb.mxu2 %v1800_v63  ;;  %1397 = vmatpush.msrb.mxu1 %v2271_v1  ;;  %v1806_v1 = vld [vmem:[%s2787_s3 + $0x350] sm:$0xff] }
 0x19d   :  { %1425 = vmatpush.msrb.mxu3 %v1801_v56 }
 0x19e   :  { %1406 = vmatpush.msrb.mxu2 %v1802_v7  ;;  %1398 = vmatpush.msrb.mxu1 %v2295_v8  ;;  %v1809_v8 = vld [vmem:[%s2787_s3 + $0x340] sm:$0xff] }
 0x19f   :  { %1426 = vmatpush.msrb.mxu3 %v1803_v25 }
 0x1a0   :  { %1407 = vmatpush.msrb.mxu2 %v1804_v61 }
 0x1a1   :  { %1427 = vmatpush.msrb.mxu3 %v1805_v9 }
 0x1a2   :  { %1408 = vmatpush.msrb.mxu2 %v1806_v1 }
 0x1a3   :  { %1428 = vmatpush.msrb.mxu3 %v1807_v5 }
 0x1a4   :  { %1409 = vmatpush.msrb.mxu2 %v1808_v13 }
 0x1a5   :  { %1429 = vmatpush.msrb.mxu3 %v2242_v58 }
 0x1a6   :  { %1410 = vmatpush.msrb.mxu2 %v1809_v8 }
 0x1a7   :  { %1430 = vmatpush.msrb.mxu3 %v2261_v62 }
 0x1a8   :  { %1411 = vmatpush.msrb.mxu2 %v2280_v3 }
 0x1a9   :  { %1431 = vmatpush.msrb.mxu3 %v2285_v4 }
 0x1aa   :  { %1412 = vmatpush.msrb.mxu2 %v2306_v11  ;;  %v1024_v49 = vpop.f32.mrf.mxu3 }
 0x1ab   :  { %1432 = vmatpush.msrb.mxu3 %v2311_v12  ;;  %v1004_v34 = vpop.f32.mrf.mxu2 }
 0x1ac   :  { %1413 = vmatpush.msrb.mxu2 %v2329_v22  ;;  %v1025_v58 = vadd.f32 %v1024_v49, %v1004_v34 }
 0x1ad   :  { %1433 = vmatpush.msrb.mxu3 %v2320_v17 }
 0x1ae   :  { %1414 = vmatpush.msrb.mxu2 %v2340_v28  ;;  %v1268_v62 = vsub.f32 %v1025_v58, %v750_v44 }
 0x1af   :  { %1434 = vmatpush.msrb.mxu3 %v2334_v23 }
 0x1b0   :  { %1415 = vmatpush.msrb.mxu2 %v2352_v33  ;;  %v1276_v3 = vmul.f32 %v1268_v62, %v1268_v62 }
 0x1b1   :  { %1435 = vmatpush.msrb.mxu3 %v2347_v29 }
 0x1b2   :  { %1416 = vmatpush.msrb.mxu2 %v2364_v38  ;;  %1319 = vmatmul.f32.vlgmr.msra.gmra.mxu1 %v1276_v3 }
 0x1b3   :  { %1436 = vmatpush.msrb.mxu3 %v2358_v36 }
 0x1b4   :  { %1417 = vmatpush.msrb.mxu2 %v2376_v47 }
 0x1b5   :  { %1437 = vmatpush.msrb.mxu3 %v2370_v42  ;;  %v1084_v4 = vpop.f32.mrf.mxu2 }
 0x1b6   :  { %1418 = vmatpush.msrb.mxu2 %v2388_v53 }
 0x1b7   :  { %1438 = vmatpush.msrb.mxu3 %v2382_v51 }
 0x1bb   :  { %v1104_v44 = vpop.f32.mrf.mxu3 }
 0x1bc   :  { %v1105_v11 = vadd.f32 %v1104_v44, %v1084_v4 }
 0x1be   :  { %v1270_v12 = vsub.f32 %v1105_v11, %v752_v10 }
 0x1bf   :  { %v1124_v17 = vpop.f32.mrf.mxu0  ;;  %v1144_v23 = vpop.f32.mrf.mxu1 }
 0x1c0   :  { %v1278_v22 = vmul.f32 %v1270_v12, %v1270_v12  ;;  %v1145_v28 = vadd.f32 %v1144_v23, %v1124_v17 }
 0x1c2   :  { %1359 = vmatmul.f32.vlgmr.msra.gmra.mxu3 %v1278_v22  ;;  %v1271_v29 = vsub.f32 %v1145_v28, %v753_v41 }
 0x1c4   :  { %v1279_v33 = vmul.f32 %v1271_v29, %v1271_v29 }
 0x1c6   :  { %1379 = vmatmul.f32.vlgmr.msrb.gmra.mxu0 %v1279_v33 }
 0x1d5   :  { %v1204_v36 = vpop.f32.mrf.mxu0 }
 0x1d6   :  { %v1224_v38 = vpop.f32.mrf.mxu1 }
 0x1d7   :  { %v1225_v42 = vadd.f32 %v1224_v38, %v1204_v36 }
 0x1d8   :  { %v1164_v47 = vpop.f32.mrf.mxu2 }
 0x1d9   :  { %v1273_v51 = vsub.f32 %v1225_v42, %v755_v14 }
 0x1db   :  { %v1184_v53 = vpop.f32.mrf.mxu3  ;;  %v1281_v50 = vmul.f32 %v1273_v51, %v1273_v51 }
 0x1dc   :  { %v1185_v10 = vadd.f32 %v1184_v53, %v1164_v47 }
 0x1dd   :  { %1419 = vmatmul.f32.vlgmr.msrb.gmra.mxu2 %v1281_v50 }
 0x1de   :  { %v1272_v27 = vsub.f32 %v1185_v10, %v754_v20 }
 0x1e0   :  { %v1280_v30 = vmul.f32 %v1272_v27, %v1272_v27 }
 0x1e2   :  { %1399 = vmatmul.f32.vlgmr.msrb.gmra.mxu1 %v1280_v30 }
 0x1fa   :  { %v1244_v24 = vpop.f32.mrf.mxu2 }
 0x1fb   :  { %v1264_v41 = vpop.f32.mrf.mxu3 }
 0x1fc   :  { %v1265_v32 = vadd.f32 %v1264_v41, %v1244_v24 }
 0x1fe   :  { %v1274_v15 = vsub.f32 %v1265_v32, %v756_v57  ;;  %v1300_v18 = vpop.f32.mrf.mxu0 }
 0x1ff   :  { %v1301_v14 = vadd.f32 %v1300_v18, %v2424_v19 }
 0x200   :  { %v1282_v16 = vmul.f32 %v1274_v15, %v1274_v15 }
 0x202   :  { %1439 = vmatmul.f32.vlgmr.msrb.gmra.mxu3 %v1282_v16 }
 0x21e   :  { %v1340_v26 = vpop.f32.mrf.mxu2 }
 0x22f   :  { %v1320_v39 = vpop.f32.mrf.mxu1 }
 0x230   :  { %v1321_v21 = vadd.f32 %v1320_v39, %v1301_v14 }
 0x232   :  { %v1341_v37 = vadd.f32 %v1340_v26, %v1321_v21 }
 0x243   :  { %v1380_v45 = vpop.f32.mrf.mxu0 }
 0x245   :  { %v1360_v35 = vpop.f32.mrf.mxu3 }
 0x246   :  { %v1361_v20 = vadd.f32 %v1360_v35, %v1341_v37 }
 0x248   :  { %v1381_v48 = vadd.f32 %v1380_v45, %v1361_v20 }
 0x25f   :  { %v1400_v43 = vpop.f32.mrf.mxu1 }
 0x260   :  { %v1401_v52 = vadd.f32 %v1400_v43, %v1381_v48  ;;  %v1420_v55 = vpop.f32.mrf.mxu2 }
 0x262   :  { %v1421_v54 = vadd.f32 %v1420_v55, %v1401_v52 }
 0x285   :  { %v1440_v6 = vpop.f32.mrf.mxu3 }
 0x286   :  { %v1441_v31 = vadd.f32 %v1440_v6, %v1421_v54 }
 0x288   :  { %1444 = vrot.lane.b32.xlu0 %v1441_v31, %s1838_s24 }
 0x2fa   :  { %v1445_v57 = vpop.permute.xlu0 %1444 }
 0x2fb   :  { %v1448_v19 = vsel %vm1447_vm0, %v2713_v0, %v1445_v57 }
 0x2fc   :  { %1449 = vst [vmem:[%s2789_s5] sm:$0x1] %v1448_v19 }
 0x2fd   :  { %1454 = vsyncpa [#allocation3], 1 }

</bundles_post_ra>
